<compile_context>
chip_gen: v5e
topology: v5e:2x2
jax: 0.10.0
libtpu: 0.0.40
codegen_flags: <defaults>
</compile_context>

<pallas_src>
import functools

import jax
import jax.numpy as jnp
from jax.experimental import pallas as pl
from jax.experimental.pallas import tpu as pltpu

# Architecture constants (mirror the PyTorch ConvNet).
C0 = 1    # input channels
C1 = 16   # conv1 out channels
C2 = 32   # conv2 out channels
C3 = 16   # deconv1 out channels
C4 = 1    # deconv2 out channels


# ---------------------------------------------------------------------------
# In-kernel helpers
# ---------------------------------------------------------------------------
def _interleave_rows(y0, y1):
    """rows -> [y0[0], y1[0], y0[1], y1[1], ...] via exact 0/1 permutation matmuls (MXU)."""
    m = y0.shape[0]
    r = jax.lax.broadcasted_iota(jnp.int32, (2 * m, m), 0)
    c = jax.lax.broadcasted_iota(jnp.int32, (2 * m, m), 1)
    p0 = jnp.where(r == 2 * c, 1.0, 0.0)
    p1 = jnp.where(r == 2 * c + 1, 1.0, 0.0)
    return (jnp.dot(p0, y0, preferred_element_type=jnp.float32)
            + jnp.dot(p1, y1, preferred_element_type=jnp.float32))


def _convnet_kernel(x_ref, w1_ref, b1_ref, w2_ref, b2_ref,
                    d1w0_ref, d1w1_ref, d1b_ref,
                    d2w0_ref, d2w1_ref, d2b_ref,
                    out_ref,
                    pad1, h1, t1, pad2, h2, t2, g2, *, H, W):
    """One grid step = one image. Activation layout: (image rows, W*C) lanes."""
    f32 = jnp.float32
    H2, W2 = H // 2, W // 2
    H3, W3 = H // 4, W // 4

    # ---------------- conv1 3x3 (pad 1) + ReLU ----------------
    pad1[...] = jnp.zeros_like(pad1)
    pad1[1:H + 1, 1:W + 1] = x_ref[0]                       # zero-padded input slab in VMEM
    acc = jnp.zeros((H, W * C1), f32) + b1_ref[...]
    kw1 = (W + 2) * C0
    for dy in range(3):                                     # in-kernel im2col: 3 banded matmuls
        acc = acc + jnp.dot(pad1[dy:dy + H, :],
                            w1_ref[dy * kw1:(dy + 1) * kw1, :],
                            preferred_element_type=f32)
    h1[...] = jnp.maximum(acc, 0.0)                         # (H, W*C1), 256 lanes

    # ---------------- maxpool 2x2 -> padded conv2 input ----------------
    for jo in range(W2):                                    # max over adjacent column blocks
        t1[:, jo * C1:(jo + 1) * C1] = jnp.maximum(
            h1[:, (2 * jo) * C1:(2 * jo + 1) * C1],
            h1[:, (2 * jo + 1) * C1:(2 * jo + 2) * C1])
    pad2[...] = jnp.zeros_like(pad2)
    for io in range(H2):                                    # max over adjacent row pairs
        pad2[1 + io, C1:(W2 + 1) * C1] = jnp.maximum(t1[2 * io, :], t1[2 * io + 1, :])

    # ---------------- conv2 3x3 (pad 1) + ReLU ----------------
    acc = jnp.zeros((H2, W2 * C2), f32) + b2_ref[...]
    kw2 = (W2 + 2) * C1
    for dy in range(3):
        acc = acc + jnp.dot(pad2[dy:dy + H2, :],
                            w2_ref[dy * kw2:(dy + 1) * kw2, :],
                            preferred_element_type=f32)
    h2[...] = jnp.maximum(acc, 0.0)                         # (H2, W2*C2), 256 lanes

    # ---------------- maxpool 2x2 ----------------
    for jo in range(W3):
        t2[:, jo * C2:(jo + 1) * C2] = jnp.maximum(
            h2[:, (2 * jo) * C2:(2 * jo + 1) * C2],
            h2[:, (2 * jo + 1) * C2:(2 * jo + 2) * C2])
    for io in range(H3):
        g2[io, :] = jnp.maximum(t2[2 * io, :], t2[2 * io + 1, :])

    # ---------------- deconv1 2x2 stride 2 + ReLU ----------------
    v2 = g2[...]                                            # (H3, W3*C2)
    y0 = jnp.dot(v2, d1w0_ref[...], preferred_element_type=f32) + d1b_ref[...]
    y1 = jnp.dot(v2, d1w1_ref[...], preferred_element_type=f32) + d1b_ref[...]
    g3 = jnp.maximum(_interleave_rows(y0, y1), 0.0)         # (H2, W2*C3), 128 lanes

    # ---------------- deconv2 2x2 stride 2 + Sigmoid ----------------
    u0 = jnp.dot(g3, d2w0_ref[...], preferred_element_type=f32) + d2b_ref[...]
    u1 = jnp.dot(g3, d2w1_ref[...], preferred_element_type=f32) + d2b_ref[...]
    z = _interleave_rows(u0, u1)                            # (H, W*C4)
    out_ref[...] = 1.0 / (1.0 + jnp.exp(-z))


# ---------------------------------------------------------------------------
# One-time weight re-layout (PyTorch layouts -> matmul layouts)
# ---------------------------------------------------------------------------
def _conv_weight_matrix(w_oihw, W):
    """PyTorch (Cout, Cin, 3, 3) -> banded (3*(W+2)*Cin, W*Cout) matmul weight."""
    Cout, Cin = w_oihw.shape[0], w_oihw.shape[1]
    base = jnp.transpose(w_oihw, (2, 3, 1, 0))              # (dy, dx, ci, co)
    jp = jnp.arange(W + 2)[:, None]
    j = jnp.arange(W)[None, :]
    dx = jp - j                                             # (W+2, W)
    valid = ((dx >= 0) & (dx <= 2)).astype(w_oihw.dtype)
    blk = base[:, jnp.clip(dx, 0, 2), :, :]                 # (3, W+2, W, Cin, Cout)
    blk = blk * valid[None, :, :, None, None]
    blk = jnp.transpose(blk, (0, 1, 3, 2, 4))               # (3, W+2, Cin, W, Cout)
    return blk.reshape(3 * (W + 2) * Cin, W * Cout)


def _deconv_weight_matrix(w_iohw, W, di):
    """PyTorch (Cin, Cout, 2, 2) -> block-diagonal (W*Cin, 2*W*Cout) weight for row-offset di."""
    Cin, Cout = w_iohw.shape[0], w_iohw.shape[1]
    k = jnp.transpose(w_iohw[:, :, di, :], (0, 2, 1)).reshape(Cin, 2 * Cout)   # (ci, dj*Cout+co)
    eye = jnp.eye(W, dtype=w_iohw.dtype)
    return jnp.einsum('jk,ab->jakb', eye, k).reshape(W * Cin, 2 * W * Cout)


def prepare_params(params, H, W):
    """Call ONCE (outside jit): re-lay-out weights/biases into the kernel's matmul layouts."""
    del H  # layout only depends on the width of each layer
    W2, W3 = W // 2, W // 4
    f32 = jnp.float32
    return {
        "w1": _conv_weight_matrix(params["c1_w"], W).astype(f32),
        "b1": jnp.tile(params["c1_b"], W)[None, :].astype(f32),
        "w2": _conv_weight_matrix(params["c2_w"], W2).astype(f32),
        "b2": jnp.tile(params["c2_b"], W2)[None, :].astype(f32),
        "d1w0": _deconv_weight_matrix(params["d1_w"], W3, 0).astype(f32),
        "d1w1": _deconv_weight_matrix(params["d1_w"], W3, 1).astype(f32),
        "d1b": jnp.tile(params["d1_b"], 2 * W3)[None, :].astype(f32),
        "d2w0": _deconv_weight_matrix(params["d2_w"], W2, 0).astype(f32),
        "d2w1": _deconv_weight_matrix(params["d2_w"], W2, 1).astype(f32),
        "d2b": jnp.tile(params["d2_b"], 2 * W2)[None, :].astype(f32),
    }


# ---------------------------------------------------------------------------
# Forward (single fused pallas_call)
# ---------------------------------------------------------------------------
def convnet_forward(prepared, x_nchw):
    B, Cin, H, W = x_nchw.shape
    assert Cin == C0
    assert H % 8 == 0 and W % 4 == 0, "needs two 2x2 pools and 8-row output blocks"
    H2, W2, H3, W3 = H // 2, W // 2, H // 4, W // 4
    x3 = x_nchw.reshape(B, H, W).astype(jnp.float32)

    kernel = functools.partial(_convnet_kernel, H=H, W=W)

    def full2d(a):
        return pl.BlockSpec(a.shape, lambda b: (0, 0))      # same block every step -> no re-fetch

    grid_spec = pltpu.PrefetchScalarGridSpec(
        num_scalar_prefetch=0,
        grid=(B,),
        in_specs=[
            pl.BlockSpec((1, H, W), lambda b: (b, 0, 0)),    # one image per grid step
            full2d(prepared["w1"]), full2d(prepared["b1"]),
            full2d(prepared["w2"]), full2d(prepared["b2"]),
            full2d(prepared["d1w0"]), full2d(prepared["d1w1"]), full2d(prepared["d1b"]),
            full2d(prepared["d2w0"]), full2d(prepared["d2w1"]), full2d(prepared["d2b"]),
        ],
        out_specs=pl.BlockSpec((H, W * C4), lambda b: (b, 0)),
        scratch_shapes=[
            pltpu.VMEM((H + 2, (W + 2) * C0), jnp.float32),      # pad1: padded conv1 input
            pltpu.VMEM((H, W * C1), jnp.float32),                # h1:   conv1 output
            pltpu.VMEM((H, W2 * C1), jnp.float32),               # t1:   W-pooled conv1
            pltpu.VMEM((H2 + 2, (W2 + 2) * C1), jnp.float32),    # pad2: padded conv2 input
            pltpu.VMEM((H2, W2 * C2), jnp.float32),              # h2:   conv2 output
            pltpu.VMEM((H2, W3 * C2), jnp.float32),              # t2:   W-pooled conv2
            pltpu.VMEM((H3, W3 * C2), jnp.float32),              # g2:   pool2 output
        ],
    )

    out = pl.pallas_call(
        kernel,
        out_shape=jax.ShapeDtypeStruct((B * H, W * C4), jnp.float32),
        grid_spec=grid_spec,
        compiler_params=pltpu.CompilerParams(
            dimension_semantics=("parallel",)),              # batch images across TCs (v7x)
    )(x3, prepared["w1"], prepared["b1"], prepared["w2"], prepared["b2"],
      prepared["d1w0"], prepared["d1w1"], prepared["d1b"],
      prepared["d2w0"], prepared["d2w1"], prepared["d2b"])

    return out.reshape(B, 1, H, W)                           # NCHW like PyTorch


# ---------------------------------------------------------------------------
# Parameters (PyTorch layouts) + pure-JAX reference
# ---------------------------------------------------------------------------
def init_params(key):
    keys = jax.random.split(key, 8)

    def u(k, shape, fan_in):
        bound = 1.0 / jnp.sqrt(jnp.float32(fan_in))
        return jax.random.uniform(k, shape, jnp.float32, -bound, bound)

    return {
        # encoder (Conv2d weights: (out, in, kH, kW))
        "c1_w": u(keys[0], (C1, C0, 3, 3), C0 * 9),
        "c1_b": u(keys[1], (C1,), C0 * 9),
        "c2_w": u(keys[2], (C2, C1, 3, 3), C1 * 9),
        "c2_b": u(keys[3], (C2,), C1 * 9),
        # decoder (ConvTranspose2d weights: (in, out, kH, kW))
        "d1_w": u(keys[4], (C2, C3, 2, 2), C2 * 4),
        "d1_b": u(keys[5], (C3,), C2 * 4),
        "d2_w": u(keys[6], (C3, C4, 2, 2), C3 * 4),
        "d2_b": u(keys[7], (C4,), C3 * 4),
    }


def convnet_reference(params, x_nchw):
    """Pure-JAX reference matching the PyTorch module (used only for validation)."""
    dn = ("NCHW", "OIHW", "NCHW")
    hp = jax.lax.Precision.HIGHEST
    h = jax.lax.conv_general_dilated(x_nchw, params["c1_w"], (1, 1), ((1, 1), (1, 1)),
                                     dimension_numbers=dn, precision=hp)
    h = jax.nn.relu(h + params["c1_b"][None, :, None, None])
    h = jax.lax.reduce_window(h, -jnp.inf, jax.lax.max, (1, 1, 2, 2), (1, 1, 2, 2), "VALID")
    h = jax.lax.conv_general_dilated(h, params["c2_w"], (1, 1), ((1, 1), (1, 1)),
                                     dimension_numbers=dn, precision=hp)
    h = jax.nn.relu(h + params["c2_b"][None, :, None, None])
    h = jax.lax.reduce_window(h, -jnp.inf, jax.lax.max, (1, 1, 2, 2), (1, 1, 2, 2), "VALID")

    def deconv2x2(v, w, b):  # ConvTranspose2d(k=2, s=2): disjoint 2x2 scatter
        n, _, hh, ww = v.shape
        cout = w.shape[1]
        y = jnp.einsum('ncij,cokl->noikjl', v, w, precision=hp)
        return y.reshape(n, cout, 2 * hh, 2 * ww) + b[None, :, None, None]

    h = jax.nn.relu(deconv2x2(h, params["d1_w"], params["d1_b"]))
    return jax.nn.sigmoid(deconv2x2(h, params["d2_w"], params["d2_b"]))


if __name__ == "__main__":
    key = jax.random.PRNGKey(0)
    pkey, xkey = jax.random.split(key)
    params = init_params(pkey)
    x = jax.random.uniform(xkey, (2, 1, 16, 16), dtype=jnp.float32)   # NCHW like PyTorch

    prepared = prepare_params(params, H=16, W=16)        # one-time weight re-layout (outside jit)
    y = jax.block_until_ready(jax.jit(convnet_forward)(prepared, x))

    assert y.shape == (2, 1, 16, 16), y.shape
    assert bool(jnp.all(jnp.isfinite(y)))
    assert bool(jnp.all((y >= 0.0) & (y <= 1.0)))        # sigmoid output range

    y_ref = convnet_reference(params, x)
    max_err = float(jnp.max(jnp.abs(y - y_ref)))
    assert max_err < 1e-2, max_err                        # loose bound: MXU f32 pass differences only

    print("KERNEL_OK")
</pallas_src>

<mosaic_0001>
module attributes {stable_mosaic.version = 11 : i64} {
  func.func @_convnet_kernel(%arg0: i32, %arg1: memref<1x16x16xf32, #tpu.memory_space<vmem>>, %arg2: memref<54x256xf32, #tpu.memory_space<vmem>>, %arg3: memref<1x256xf32, #tpu.memory_space<vmem>>, %arg4: memref<480x256xf32, #tpu.memory_space<vmem>>, %arg5: memref<1x256xf32, #tpu.memory_space<vmem>>, %arg6: memref<128x128xf32, #tpu.memory_space<vmem>>, %arg7: memref<128x128xf32, #tpu.memory_space<vmem>>, %arg8: memref<1x128xf32, #tpu.memory_space<vmem>>, %arg9: memref<128x16xf32, #tpu.memory_space<vmem>>, %arg10: memref<128x16xf32, #tpu.memory_space<vmem>>, %arg11: memref<1x16xf32, #tpu.memory_space<vmem>>, %arg12: memref<16x16xf32, #tpu.memory_space<vmem>>, %arg13: memref<18x18xf32, #tpu.memory_space<vmem>>, %arg14: memref<16x256xf32, #tpu.memory_space<vmem>>, %arg15: memref<16x128xf32, #tpu.memory_space<vmem>>, %arg16: memref<10x160xf32, #tpu.memory_space<vmem>>, %arg17: memref<8x256xf32, #tpu.memory_space<vmem>>, %arg18: memref<8x128xf32, #tpu.memory_space<vmem>>, %arg19: memref<4x128xf32, #tpu.memory_space<vmem>>) attributes {dimension_semantics = [#tpu.dimension_semantics<parallel>], iteration_bounds = array<i64: 2>, scalar_prefetch = 0 : i64, scratch_operands = 7 : i64, tpu.core_type = #tpu.core_type<tc>, window_params = [{transform_indices = @transform_0, window_bounds = array<i64: 1, 16, 16>}, {pipeline_mode = #tpu.pipeline_mode<synchronous>, transform_indices = @transform_1, window_bounds = array<i64: 54, 256>}, {pipeline_mode = #tpu.pipeline_mode<synchronous>, transform_indices = @transform_2, window_bounds = array<i64: 1, 256>}, {pipeline_mode = #tpu.pipeline_mode<synchronous>, transform_indices = @transform_3, window_bounds = array<i64: 480, 256>}, {pipeline_mode = #tpu.pipeline_mode<synchronous>, transform_indices = @transform_4, window_bounds = array<i64: 1, 256>}, {pipeline_mode = #tpu.pipeline_mode<synchronous>, transform_indices = @transform_5, window_bounds = array<i64: 128, 128>}, {pipeline_mode = #tpu.pipeline_mode<synchronous>, transform_indices = @transform_6, window_bounds = array<i64: 128, 128>}, {pipeline_mode = #tpu.pipeline_mode<synchronous>, transform_indices = @transform_7, window_bounds = array<i64: 1, 128>}, {pipeline_mode = #tpu.pipeline_mode<synchronous>, transform_indices = @transform_8, window_bounds = array<i64: 128, 16>}, {pipeline_mode = #tpu.pipeline_mode<synchronous>, transform_indices = @transform_9, window_bounds = array<i64: 128, 16>}, {pipeline_mode = #tpu.pipeline_mode<synchronous>, transform_indices = @transform_10, window_bounds = array<i64: 1, 16>}, {transform_indices = @transform_11, window_bounds = array<i64: 16, 16>}]} {
    %cst = arith.constant 0.000000e+00 : f32
    %0 = vector.broadcast %cst : f32 to vector<18x18xf32>
    %c0 = arith.constant 0 : index
    %c0_0 = arith.constant 0 : index
    %1 = vector.load %arg13[%c0, %c0_0] : memref<18x18xf32, #tpu.memory_space<vmem>>, vector<18x18xf32>
    tpu.vector_store %arg13[%c0, %c0_0], %0 {strides = array<i32>} : memref<18x18xf32, #tpu.memory_space<vmem>>, vector<18x18xf32>,
    %c0_1 = arith.constant 0 : index
    %c0_2 = arith.constant 0 : index
    %c0_3 = arith.constant 0 : index
    %2 = vector.load %arg1[%c0_1, %c0_2, %c0_3] : memref<1x16x16xf32, #tpu.memory_space<vmem>>, vector<1x16x16xf32>
    %3 = vector.shape_cast %2 : vector<1x16x16xf32> to vector<16x16xf32>
    %c1 = arith.constant 1 : index
    %c1_4 = arith.constant 1 : index
    %4 = vector.load %arg13[%c1, %c1_4] : memref<18x18xf32, #tpu.memory_space<vmem>>, vector<16x16xf32>
    tpu.vector_store %arg13[%c1, %c1_4], %3 {strides = array<i32>} : memref<18x18xf32, #tpu.memory_space<vmem>>, vector<16x16xf32>,
    %cst_5 = arith.constant 0.000000e+00 : f32
    %5 = vector.broadcast %cst_5 : f32 to vector<16x256xf32>
    %c0_6 = arith.constant 0 : index
    %c0_7 = arith.constant 0 : index
    %6 = vector.load %arg3[%c0_6, %c0_7] : memref<1x256xf32, #tpu.memory_space<vmem>>, vector<1x256xf32>
    %7 = vector.broadcast %6 : vector<1x256xf32> to vector<16x256xf32>
    %8 = arith.addf %5, %7 : vector<16x256xf32>
    %c0_8 = arith.constant 0 : index
    %c0_9 = arith.constant 0 : index
    %9 = vector.load %arg13[%c0_8, %c0_9] : memref<18x18xf32, #tpu.memory_space<vmem>>, vector<16x18xf32>
    %c0_10 = arith.constant 0 : index
    %c0_11 = arith.constant 0 : index
    %10 = vector.load %arg2[%c0_10, %c0_11] : memref<54x256xf32, #tpu.memory_space<vmem>>, vector<18x256xf32>
    %cst_12 = arith.constant dense<0.000000e+00> : vector<16x256xf32>
    %11 = tpu.matmul %9, %10, %cst_12 {dimension_numbers = #tpu.dot_dimension_numbers<[1], [0], [0], [1], [0, 0, 1, 1], [], []>} : vector<16x18xf32>, vector<18x256xf32>, vector<16x256xf32> -> vector<16x256xf32>
    %12 = arith.addf %8, %11 : vector<16x256xf32>
    %c1_13 = arith.constant 1 : index
    %c0_14 = arith.constant 0 : index
    %13 = vector.load %arg13[%c1_13, %c0_14] : memref<18x18xf32, #tpu.memory_space<vmem>>, vector<16x18xf32>
    %c18 = arith.constant 18 : index
    %c0_15 = arith.constant 0 : index
    %14 = vector.load %arg2[%c18, %c0_15] : memref<54x256xf32, #tpu.memory_space<vmem>>, vector<18x256xf32>
    %cst_16 = arith.constant dense<0.000000e+00> : vector<16x256xf32>
    %15 = tpu.matmul %13, %14, %cst_16 {dimension_numbers = #tpu.dot_dimension_numbers<[1], [0], [0], [1], [0, 0, 1, 1], [], []>} : vector<16x18xf32>, vector<18x256xf32>, vector<16x256xf32> -> vector<16x256xf32>
    %16 = arith.addf %12, %15 : vector<16x256xf32>
    %c2 = arith.constant 2 : index
    %c0_17 = arith.constant 0 : index
    %17 = vector.load %arg13[%c2, %c0_17] : memref<18x18xf32, #tpu.memory_space<vmem>>, vector<16x18xf32>
    %c36 = arith.constant 36 : index
    %c0_18 = arith.constant 0 : index
    %18 = vector.load %arg2[%c36, %c0_18] : memref<54x256xf32, #tpu.memory_space<vmem>>, vector<18x256xf32>
    %cst_19 = arith.constant dense<0.000000e+00> : vector<16x256xf32>
    %19 = tpu.matmul %17, %18, %cst_19 {dimension_numbers = #tpu.dot_dimension_numbers<[1], [0], [0], [1], [0, 0, 1, 1], [], []>} : vector<16x18xf32>, vector<18x256xf32>, vector<16x256xf32> -> vector<16x256xf32>
    %20 = arith.addf %16, %19 : vector<16x256xf32>
    %cst_20 = arith.constant 0.000000e+00 : f32
    %21 = vector.broadcast %cst_20 : f32 to vector<16x256xf32>
    %22 = arith.maximumf %20, %21 : vector<16x256xf32>
    %c0_21 = arith.constant 0 : index
    %c0_22 = arith.constant 0 : index
    %23 = vector.load %arg14[%c0_21, %c0_22] : memref<16x256xf32, #tpu.memory_space<vmem>>, vector<16x256xf32>
    tpu.vector_store %arg14[%c0_21, %c0_22], %22 {strides = array<i32>} : memref<16x256xf32, #tpu.memory_space<vmem>>, vector<16x256xf32>,
    %c0_23 = arith.constant 0 : index
    %c0_24 = arith.constant 0 : index
    %24 = vector.load %arg14[%c0_23, %c0_24] : memref<16x256xf32, #tpu.memory_space<vmem>>, vector<16x16xf32>
    %c0_25 = arith.constant 0 : index
    %c16 = arith.constant 16 : index
    %25 = vector.load %arg14[%c0_25, %c16] : memref<16x256xf32, #tpu.memory_space<vmem>>, vector<16x16xf32>
    %26 = arith.maximumf %24, %25 : vector<16x16xf32>
    %c0_26 = arith.constant 0 : index
    %c0_27 = arith.constant 0 : index
    %27 = vector.load %arg15[%c0_26, %c0_27] : memref<16x128xf32, #tpu.memory_space<vmem>>, vector<16x16xf32>
    tpu.vector_store %arg15[%c0_26, %c0_27], %26 {strides = array<i32>} : memref<16x128xf32, #tpu.memory_space<vmem>>, vector<16x16xf32>,
    %c0_28 = arith.constant 0 : index
    %c32 = arith.constant 32 : index
    %28 = vector.load %arg14[%c0_28, %c32] : memref<16x256xf32, #tpu.memory_space<vmem>>, vector<16x16xf32>
    %c0_29 = arith.constant 0 : index
    %c48 = arith.constant 48 : index
    %29 = vector.load %arg14[%c0_29, %c48] : memref<16x256xf32, #tpu.memory_space<vmem>>, vector<16x16xf32>
    %30 = arith.maximumf %28, %29 : vector<16x16xf32>
    %c0_30 = arith.constant 0 : index
    %c16_31 = arith.constant 16 : index
    %31 = vector.load %arg15[%c0_30, %c16_31] : memref<16x128xf32, #tpu.memory_space<vmem>>, vector<16x16xf32>
    tpu.vector_store %arg15[%c0_30, %c16_31], %30 {strides = array<i32>} : memref<16x128xf32, #tpu.memory_space<vmem>>, vector<16x16xf32>,
    %c0_32 = arith.constant 0 : index
    %c64 = arith.constant 64 : index
    %32 = vector.load %arg14[%c0_32, %c64] : memref<16x256xf32, #tpu.memory_space<vmem>>, vector<16x16xf32>
    %c0_33 = arith.constant 0 : index
    %c80 = arith.constant 80 : index
    %33 = vector.load %arg14[%c0_33, %c80] : memref<16x256xf32, #tpu.memory_space<vmem>>, vector<16x16xf32>
    %34 = arith.maximumf %32, %33 : vector<16x16xf32>
    %c0_34 = arith.constant 0 : index
    %c32_35 = arith.constant 32 : index
    %35 = vector.load %arg15[%c0_34, %c32_35] : memref<16x128xf32, #tpu.memory_space<vmem>>, vector<16x16xf32>
    tpu.vector_store %arg15[%c0_34, %c32_35], %34 {strides = array<i32>} : memref<16x128xf32, #tpu.memory_space<vmem>>, vector<16x16xf32>,
    %c0_36 = arith.constant 0 : index
    %c96 = arith.constant 96 : index
    %36 = vector.load %arg14[%c0_36, %c96] : memref<16x256xf32, #tpu.memory_space<vmem>>, vector<16x16xf32>
    %c0_37 = arith.constant 0 : index
    %c112 = arith.constant 112 : index
    %37 = vector.load %arg14[%c0_37, %c112] : memref<16x256xf32, #tpu.memory_space<vmem>>, vector<16x16xf32>
    %38 = arith.maximumf %36, %37 : vector<16x16xf32>
    %c0_38 = arith.constant 0 : index
    %c48_39 = arith.constant 48 : index
    %39 = vector.load %arg15[%c0_38, %c48_39] : memref<16x128xf32, #tpu.memory_space<vmem>>, vector<16x16xf32>
    tpu.vector_store %arg15[%c0_38, %c48_39], %38 {strides = array<i32>} : memref<16x128xf32, #tpu.memory_space<vmem>>, vector<16x16xf32>,
    %c0_40 = arith.constant 0 : index
    %c128 = arith.constant 128 : index
    %40 = vector.load %arg14[%c0_40, %c128] : memref<16x256xf32, #tpu.memory_space<vmem>>, vector<16x16xf32>
    %c0_41 = arith.constant 0 : index
    %c144 = arith.constant 144 : index
    %41 = vector.load %arg14[%c0_41, %c144] : memref<16x256xf32, #tpu.memory_space<vmem>>, vector<16x16xf32>
    %42 = arith.maximumf %40, %41 : vector<16x16xf32>
    %c0_42 = arith.constant 0 : index
    %c64_43 = arith.constant 64 : index
    %43 = vector.load %arg15[%c0_42, %c64_43] : memref<16x128xf32, #tpu.memory_space<vmem>>, vector<16x16xf32>
    tpu.vector_store %arg15[%c0_42, %c64_43], %42 {strides = array<i32>} : memref<16x128xf32, #tpu.memory_space<vmem>>, vector<16x16xf32>,
    %c0_44 = arith.constant 0 : index
    %c160 = arith.constant 160 : index
    %44 = vector.load %arg14[%c0_44, %c160] : memref<16x256xf32, #tpu.memory_space<vmem>>, vector<16x16xf32>
    %c0_45 = arith.constant 0 : index
    %c176 = arith.constant 176 : index
    %45 = vector.load %arg14[%c0_45, %c176] : memref<16x256xf32, #tpu.memory_space<vmem>>, vector<16x16xf32>
    %46 = arith.maximumf %44, %45 : vector<16x16xf32>
    %c0_46 = arith.constant 0 : index
    %c80_47 = arith.constant 80 : index
    %47 = vector.load %arg15[%c0_46, %c80_47] : memref<16x128xf32, #tpu.memory_space<vmem>>, vector<16x16xf32>
    tpu.vector_store %arg15[%c0_46, %c80_47], %46 {strides = array<i32>} : memref<16x128xf32, #tpu.memory_space<vmem>>, vector<16x16xf32>,
    %c0_48 = arith.constant 0 : index
    %c192 = arith.constant 192 : index
    %48 = vector.load %arg14[%c0_48, %c192] : memref<16x256xf32, #tpu.memory_space<vmem>>, vector<16x16xf32>
    %c0_49 = arith.constant 0 : index
    %c208 = arith.constant 208 : index
    %49 = vector.load %arg14[%c0_49, %c208] : memref<16x256xf32, #tpu.memory_space<vmem>>, vector<16x16xf32>
    %50 = arith.maximumf %48, %49 : vector<16x16xf32>
    %c0_50 = arith.constant 0 : index
    %c96_51 = arith.constant 96 : index
    %51 = vector.load %arg15[%c0_50, %c96_51] : memref<16x128xf32, #tpu.memory_space<vmem>>, vector<16x16xf32>
    tpu.vector_store %arg15[%c0_50, %c96_51], %50 {strides = array<i32>} : memref<16x128xf32, #tpu.memory_space<vmem>>, vector<16x16xf32>,
    %c0_52 = arith.constant 0 : index
    %c224 = arith.constant 224 : index
    %52 = vector.load %arg14[%c0_52, %c224] : memref<16x256xf32, #tpu.memory_space<vmem>>, vector<16x16xf32>
    %c0_53 = arith.constant 0 : index
    %c240 = arith.constant 240 : index
    %53 = vector.load %arg14[%c0_53, %c240] : memref<16x256xf32, #tpu.memory_space<vmem>>, vector<16x16xf32>
    %54 = arith.maximumf %52, %53 : vector<16x16xf32>
    %c0_54 = arith.constant 0 : index
    %c112_55 = arith.constant 112 : index
    %55 = vector.load %arg15[%c0_54, %c112_55] : memref<16x128xf32, #tpu.memory_space<vmem>>, vector<16x16xf32>
    tpu.vector_store %arg15[%c0_54, %c112_55], %54 {strides = array<i32>} : memref<16x128xf32, #tpu.memory_space<vmem>>, vector<16x16xf32>,
    %cst_56 = arith.constant 0.000000e+00 : f32
    %56 = vector.broadcast %cst_56 : f32 to vector<10x160xf32>
    %c0_57 = arith.constant 0 : index
    %c0_58 = arith.constant 0 : index
    %57 = vector.load %arg16[%c0_57, %c0_58] : memref<10x160xf32, #tpu.memory_space<vmem>>, vector<10x160xf32>
    tpu.vector_store %arg16[%c0_57, %c0_58], %56 {strides = array<i32>} : memref<10x160xf32, #tpu.memory_space<vmem>>, vector<10x160xf32>,
    %c0_59 = arith.constant 0 : index
    %c0_60 = arith.constant 0 : index
    %58 = vector.load %arg15[%c0_59, %c0_60] : memref<16x128xf32, #tpu.memory_space<vmem>>, vector<1x128xf32>
    %59 = vector.shape_cast %58 : vector<1x128xf32> to vector<128xf32>
    %c1_61 = arith.constant 1 : index
    %c0_62 = arith.constant 0 : index
    %60 = vector.load %arg15[%c1_61, %c0_62] : memref<16x128xf32, #tpu.memory_space<vmem>>, vector<1x128xf32>
    %61 = vector.shape_cast %60 : vector<1x128xf32> to vector<128xf32>
    %62 = arith.maximumf %59, %61 : vector<128xf32>
    %c1_63 = arith.constant 1 : index
    %c16_64 = arith.constant 16 : index
    %63 = vector.load %arg16[%c1_63, %c16_64] : memref<10x160xf32, #tpu.memory_space<vmem>>, vector<1x128xf32>
    %64 = vector.shape_cast %63 : vector<1x128xf32> to vector<128xf32>
    %65 = vector.shape_cast %62 : vector<128xf32> to vector<1x128xf32>
    tpu.vector_store %arg16[%c1_63, %c16_64], %65 {strides = array<i32>} : memref<10x160xf32, #tpu.memory_space<vmem>>, vector<1x128xf32>,
    %c2_65 = arith.constant 2 : index
    %c0_66 = arith.constant 0 : index
    %66 = vector.load %arg15[%c2_65, %c0_66] : memref<16x128xf32, #tpu.memory_space<vmem>>, vector<1x128xf32>
    %67 = vector.shape_cast %66 : vector<1x128xf32> to vector<128xf32>
    %c3 = arith.constant 3 : index
    %c0_67 = arith.constant 0 : index
    %68 = vector.load %arg15[%c3, %c0_67] : memref<16x128xf32, #tpu.memory_space<vmem>>, vector<1x128xf32>
    %69 = vector.shape_cast %68 : vector<1x128xf32> to vector<128xf32>
    %70 = arith.maximumf %67, %69 : vector<128xf32>
    %c2_68 = arith.constant 2 : index
    %c16_69 = arith.constant 16 : index
    %71 = vector.load %arg16[%c2_68, %c16_69] : memref<10x160xf32, #tpu.memory_space<vmem>>, vector<1x128xf32>
    %72 = vector.shape_cast %71 : vector<1x128xf32> to vector<128xf32>
    %73 = vector.shape_cast %70 : vector<128xf32> to vector<1x128xf32>
    tpu.vector_store %arg16[%c2_68, %c16_69], %73 {strides = array<i32>} : memref<10x160xf32, #tpu.memory_space<vmem>>, vector<1x128xf32>,
    %c4 = arith.constant 4 : index
    %c0_70 = arith.constant 0 : index
    %74 = vector.load %arg15[%c4, %c0_70] : memref<16x128xf32, #tpu.memory_space<vmem>>, vector<1x128xf32>
    %75 = vector.shape_cast %74 : vector<1x128xf32> to vector<128xf32>
    %c5 = arith.constant 5 : index
    %c0_71 = arith.constant 0 : index
    %76 = vector.load %arg15[%c5, %c0_71] : memref<16x128xf32, #tpu.memory_space<vmem>>, vector<1x128xf32>
    %77 = vector.shape_cast %76 : vector<1x128xf32> to vector<128xf32>
    %78 = arith.maximumf %75, %77 : vector<128xf32>
    %c3_72 = arith.constant 3 : index
    %c16_73 = arith.constant 16 : index
    %79 = vector.load %arg16[%c3_72, %c16_73] : memref<10x160xf32, #tpu.memory_space<vmem>>, vector<1x128xf32>
    %80 = vector.shape_cast %79 : vector<1x128xf32> to vector<128xf32>
    %81 = vector.shape_cast %78 : vector<128xf32> to vector<1x128xf32>
    tpu.vector_store %arg16[%c3_72, %c16_73], %81 {strides = array<i32>} : memref<10x160xf32, #tpu.memory_space<vmem>>, vector<1x128xf32>,
    %c6 = arith.constant 6 : index
    %c0_74 = arith.constant 0 : index
    %82 = vector.load %arg15[%c6, %c0_74] : memref<16x128xf32, #tpu.memory_space<vmem>>, vector<1x128xf32>
    %83 = vector.shape_cast %82 : vector<1x128xf32> to vector<128xf32>
    %c7 = arith.constant 7 : index
    %c0_75 = arith.constant 0 : index
    %84 = vector.load %arg15[%c7, %c0_75] : memref<16x128xf32, #tpu.memory_space<vmem>>, vector<1x128xf32>
    %85 = vector.shape_cast %84 : vector<1x128xf32> to vector<128xf32>
    %86 = arith.maximumf %83, %85 : vector<128xf32>
    %c4_76 = arith.constant 4 : index
    %c16_77 = arith.constant 16 : index
    %87 = vector.load %arg16[%c4_76, %c16_77] : memref<10x160xf32, #tpu.memory_space<vmem>>, vector<1x128xf32>
    %88 = vector.shape_cast %87 : vector<1x128xf32> to vector<128xf32>
    %89 = vector.shape_cast %86 : vector<128xf32> to vector<1x128xf32>
    tpu.vector_store %arg16[%c4_76, %c16_77], %89 {strides = array<i32>} : memref<10x160xf32, #tpu.memory_space<vmem>>, vector<1x128xf32>,
    %c8 = arith.constant 8 : index
    %c0_78 = arith.constant 0 : index
    %90 = vector.load %arg15[%c8, %c0_78] : memref<16x128xf32, #tpu.memory_space<vmem>>, vector<1x128xf32>
    %91 = vector.shape_cast %90 : vector<1x128xf32> to vector<128xf32>
    %c9 = arith.constant 9 : index
    %c0_79 = arith.constant 0 : index
    %92 = vector.load %arg15[%c9, %c0_79] : memref<16x128xf32, #tpu.memory_space<vmem>>, vector<1x128xf32>
    %93 = vector.shape_cast %92 : vector<1x128xf32> to vector<128xf32>
    %94 = arith.maximumf %91, %93 : vector<128xf32>
    %c5_80 = arith.constant 5 : index
    %c16_81 = arith.constant 16 : index
    %95 = vector.load %arg16[%c5_80, %c16_81] : memref<10x160xf32, #tpu.memory_space<vmem>>, vector<1x128xf32>
    %96 = vector.shape_cast %95 : vector<1x128xf32> to vector<128xf32>
    %97 = vector.shape_cast %94 : vector<128xf32> to vector<1x128xf32>
    tpu.vector_store %arg16[%c5_80, %c16_81], %97 {strides = array<i32>} : memref<10x160xf32, #tpu.memory_space<vmem>>, vector<1x128xf32>,
    %c10 = arith.constant 10 : index
    %c0_82 = arith.constant 0 : index
    %98 = vector.load %arg15[%c10, %c0_82] : memref<16x128xf32, #tpu.memory_space<vmem>>, vector<1x128xf32>
    %99 = vector.shape_cast %98 : vector<1x128xf32> to vector<128xf32>
    %c11 = arith.constant 11 : index
    %c0_83 = arith.constant 0 : index
    %100 = vector.load %arg15[%c11, %c0_83] : memref<16x128xf32, #tpu.memory_space<vmem>>, vector<1x128xf32>
    %101 = vector.shape_cast %100 : vector<1x128xf32> to vector<128xf32>
    %102 = arith.maximumf %99, %101 : vector<128xf32>
    %c6_84 = arith.constant 6 : index
    %c16_85 = arith.constant 16 : index
    %103 = vector.load %arg16[%c6_84, %c16_85] : memref<10x160xf32, #tpu.memory_space<vmem>>, vector<1x128xf32>
    %104 = vector.shape_cast %103 : vector<1x128xf32> to vector<128xf32>
    %105 = vector.shape_cast %102 : vector<128xf32> to vector<1x128xf32>
    tpu.vector_store %arg16[%c6_84, %c16_85], %105 {strides = array<i32>} : memref<10x160xf32, #tpu.memory_space<vmem>>, vector<1x128xf32>,
    %c12 = arith.constant 12 : index
    %c0_86 = arith.constant 0 : index
    %106 = vector.load %arg15[%c12, %c0_86] : memref<16x128xf32, #tpu.memory_space<vmem>>, vector<1x128xf32>
    %107 = vector.shape_cast %106 : vector<1x128xf32> to vector<128xf32>
    %c13 = arith.constant 13 : index
    %c0_87 = arith.constant 0 : index
    %108 = vector.load %arg15[%c13, %c0_87] : memref<16x128xf32, #tpu.memory_space<vmem>>, vector<1x128xf32>
    %109 = vector.shape_cast %108 : vector<1x128xf32> to vector<128xf32>
    %110 = arith.maximumf %107, %109 : vector<128xf32>
    %c7_88 = arith.constant 7 : index
    %c16_89 = arith.constant 16 : index
    %111 = vector.load %arg16[%c7_88, %c16_89] : memref<10x160xf32, #tpu.memory_space<vmem>>, vector<1x128xf32>
    %112 = vector.shape_cast %111 : vector<1x128xf32> to vector<128xf32>
    %113 = vector.shape_cast %110 : vector<128xf32> to vector<1x128xf32>
    tpu.vector_store %arg16[%c7_88, %c16_89], %113 {strides = array<i32>} : memref<10x160xf32, #tpu.memory_space<vmem>>, vector<1x128xf32>,
    %c14 = arith.constant 14 : index
    %c0_90 = arith.constant 0 : index
    %114 = vector.load %arg15[%c14, %c0_90] : memref<16x128xf32, #tpu.memory_space<vmem>>, vector<1x128xf32>
    %115 = vector.shape_cast %114 : vector<1x128xf32> to vector<128xf32>
    %c15 = arith.constant 15 : index
    %c0_91 = arith.constant 0 : index
    %116 = vector.load %arg15[%c15, %c0_91] : memref<16x128xf32, #tpu.memory_space<vmem>>, vector<1x128xf32>
    %117 = vector.shape_cast %116 : vector<1x128xf32> to vector<128xf32>
    %118 = arith.maximumf %115, %117 : vector<128xf32>
    %c8_92 = arith.constant 8 : index
    %c16_93 = arith.constant 16 : index
    %119 = vector.load %arg16[%c8_92, %c16_93] : memref<10x160xf32, #tpu.memory_space<vmem>>, vector<1x128xf32>
    %120 = vector.shape_cast %119 : vector<1x128xf32> to vector<128xf32>
    %121 = vector.shape_cast %118 : vector<128xf32> to vector<1x128xf32>
    tpu.vector_store %arg16[%c8_92, %c16_93], %121 {strides = array<i32>} : memref<10x160xf32, #tpu.memory_space<vmem>>, vector<1x128xf32>,
    %cst_94 = arith.constant 0.000000e+00 : f32
    %122 = vector.broadcast %cst_94 : f32 to vector<8x256xf32>
    %c0_95 = arith.constant 0 : index
    %c0_96 = arith.constant 0 : index
    %123 = vector.load %arg5[%c0_95, %c0_96] : memref<1x256xf32, #tpu.memory_space<vmem>>, vector<1x256xf32>
    %124 = vector.broadcast %123 : vector<1x256xf32> to vector<8x256xf32>
    %125 = arith.addf %122, %124 : vector<8x256xf32>
    %c0_97 = arith.constant 0 : index
    %c0_98 = arith.constant 0 : index
    %126 = vector.load %arg16[%c0_97, %c0_98] : memref<10x160xf32, #tpu.memory_space<vmem>>, vector<8x160xf32>
    %c0_99 = arith.constant 0 : index
    %c0_100 = arith.constant 0 : index
    %127 = vector.load %arg4[%c0_99, %c0_100] : memref<480x256xf32, #tpu.memory_space<vmem>>, vector<160x256xf32>
    %cst_101 = arith.constant dense<0.000000e+00> : vector<8x256xf32>
    %128 = tpu.matmul %126, %127, %cst_101 {dimension_numbers = #tpu.dot_dimension_numbers<[1], [0], [0], [1], [0, 0, 1, 1], [], []>} : vector<8x160xf32>, vector<160x256xf32>, vector<8x256xf32> -> vector<8x256xf32>
    %129 = arith.addf %125, %128 : vector<8x256xf32>
    %c1_102 = arith.constant 1 : index
    %c0_103 = arith.constant 0 : index
    %130 = vector.load %arg16[%c1_102, %c0_103] : memref<10x160xf32, #tpu.memory_space<vmem>>, vector<8x160xf32>
    %c160_104 = arith.constant 160 : index
    %c0_105 = arith.constant 0 : index
    %131 = vector.load %arg4[%c160_104, %c0_105] : memref<480x256xf32, #tpu.memory_space<vmem>>, vector<160x256xf32>
    %cst_106 = arith.constant dense<0.000000e+00> : vector<8x256xf32>
    %132 = tpu.matmul %130, %131, %cst_106 {dimension_numbers = #tpu.dot_dimension_numbers<[1], [0], [0], [1], [0, 0, 1, 1], [], []>} : vector<8x160xf32>, vector<160x256xf32>, vector<8x256xf32> -> vector<8x256xf32>
    %133 = arith.addf %129, %132 : vector<8x256xf32>
    %c2_107 = arith.constant 2 : index
    %c0_108 = arith.constant 0 : index
    %134 = vector.load %arg16[%c2_107, %c0_108] : memref<10x160xf32, #tpu.memory_space<vmem>>, vector<8x160xf32>
    %c320 = arith.constant 320 : index
    %c0_109 = arith.constant 0 : index
    %135 = vector.load %arg4[%c320, %c0_109] : memref<480x256xf32, #tpu.memory_space<vmem>>, vector<160x256xf32>
    %cst_110 = arith.constant dense<0.000000e+00> : vector<8x256xf32>
    %136 = tpu.matmul %134, %135, %cst_110 {dimension_numbers = #tpu.dot_dimension_numbers<[1], [0], [0], [1], [0, 0, 1, 1], [], []>} : vector<8x160xf32>, vector<160x256xf32>, vector<8x256xf32> -> vector<8x256xf32>
    %137 = arith.addf %133, %136 : vector<8x256xf32>
    %cst_111 = arith.constant 0.000000e+00 : f32
    %138 = vector.broadcast %cst_111 : f32 to vector<8x256xf32>
    %139 = arith.maximumf %137, %138 : vector<8x256xf32>
    %c0_112 = arith.constant 0 : index
    %c0_113 = arith.constant 0 : index
    %140 = vector.load %arg17[%c0_112, %c0_113] : memref<8x256xf32, #tpu.memory_space<vmem>>, vector<8x256xf32>
    tpu.vector_store %arg17[%c0_112, %c0_113], %139 {strides = array<i32>} : memref<8x256xf32, #tpu.memory_space<vmem>>, vector<8x256xf32>,
    %c0_114 = arith.constant 0 : index
    %c0_115 = arith.constant 0 : index
    %141 = vector.load %arg17[%c0_114, %c0_115] : memref<8x256xf32, #tpu.memory_space<vmem>>, vector<8x32xf32>
    %c0_116 = arith.constant 0 : index
    %c32_117 = arith.constant 32 : index
    %142 = vector.load %arg17[%c0_116, %c32_117] : memref<8x256xf32, #tpu.memory_space<vmem>>, vector<8x32xf32>
    %143 = arith.maximumf %141, %142 : vector<8x32xf32>
    %c0_118 = arith.constant 0 : index
    %c0_119 = arith.constant 0 : index
    %144 = vector.load %arg18[%c0_118, %c0_119] : memref<8x128xf32, #tpu.memory_space<vmem>>, vector<8x32xf32>
    tpu.vector_store %arg18[%c0_118, %c0_119], %143 {strides = array<i32>} : memref<8x128xf32, #tpu.memory_space<vmem>>, vector<8x32xf32>,
    %c0_120 = arith.constant 0 : index
    %c64_121 = arith.constant 64 : index
    %145 = vector.load %arg17[%c0_120, %c64_121] : memref<8x256xf32, #tpu.memory_space<vmem>>, vector<8x32xf32>
    %c0_122 = arith.constant 0 : index
    %c96_123 = arith.constant 96 : index
    %146 = vector.load %arg17[%c0_122, %c96_123] : memref<8x256xf32, #tpu.memory_space<vmem>>, vector<8x32xf32>
    %147 = arith.maximumf %145, %146 : vector<8x32xf32>
    %c0_124 = arith.constant 0 : index
    %c32_125 = arith.constant 32 : index
    %148 = vector.load %arg18[%c0_124, %c32_125] : memref<8x128xf32, #tpu.memory_space<vmem>>, vector<8x32xf32>
    tpu.vector_store %arg18[%c0_124, %c32_125], %147 {strides = array<i32>} : memref<8x128xf32, #tpu.memory_space<vmem>>, vector<8x32xf32>,
    %c0_126 = arith.constant 0 : index
    %c128_127 = arith.constant 128 : index
    %149 = vector.load %arg17[%c0_126, %c128_127] : memref<8x256xf32, #tpu.memory_space<vmem>>, vector<8x32xf32>
    %c0_128 = arith.constant 0 : index
    %c160_129 = arith.constant 160 : index
    %150 = vector.load %arg17[%c0_128, %c160_129] : memref<8x256xf32, #tpu.memory_space<vmem>>, vector<8x32xf32>
    %151 = arith.maximumf %149, %150 : vector<8x32xf32>
    %c0_130 = arith.constant 0 : index
    %c64_131 = arith.constant 64 : index
    %152 = vector.load %arg18[%c0_130, %c64_131] : memref<8x128xf32, #tpu.memory_space<vmem>>, vector<8x32xf32>
    tpu.vector_store %arg18[%c0_130, %c64_131], %151 {strides = array<i32>} : memref<8x128xf32, #tpu.memory_space<vmem>>, vector<8x32xf32>,
    %c0_132 = arith.constant 0 : index
    %c192_133 = arith.constant 192 : index
    %153 = vector.load %arg17[%c0_132, %c192_133] : memref<8x256xf32, #tpu.memory_space<vmem>>, vector<8x32xf32>
    %c0_134 = arith.constant 0 : index
    %c224_135 = arith.constant 224 : index
    %154 = vector.load %arg17[%c0_134, %c224_135] : memref<8x256xf32, #tpu.memory_space<vmem>>, vector<8x32xf32>
    %155 = arith.maximumf %153, %154 : vector<8x32xf32>
    %c0_136 = arith.constant 0 : index
    %c96_137 = arith.constant 96 : index
    %156 = vector.load %arg18[%c0_136, %c96_137] : memref<8x128xf32, #tpu.memory_space<vmem>>, vector<8x32xf32>
    tpu.vector_store %arg18[%c0_136, %c96_137], %155 {strides = array<i32>} : memref<8x128xf32, #tpu.memory_space<vmem>>, vector<8x32xf32>,
    %c0_138 = arith.constant 0 : index
    %c0_139 = arith.constant 0 : index
    %157 = vector.load %arg18[%c0_138, %c0_139] : memref<8x128xf32, #tpu.memory_space<vmem>>, vector<1x128xf32>
    %158 = vector.shape_cast %157 : vector<1x128xf32> to vector<128xf32>
    %c1_140 = arith.constant 1 : index
    %c0_141 = arith.constant 0 : index
    %159 = vector.load %arg18[%c1_140, %c0_141] : memref<8x128xf32, #tpu.memory_space<vmem>>, vector<1x128xf32>
    %160 = vector.shape_cast %159 : vector<1x128xf32> to vector<128xf32>
    %161 = arith.maximumf %158, %160 : vector<128xf32>
    %c0_142 = arith.constant 0 : index
    %c0_143 = arith.constant 0 : index
    %162 = vector.load %arg19[%c0_142, %c0_143] : memref<4x128xf32, #tpu.memory_space<vmem>>, vector<1x128xf32>
    %163 = vector.shape_cast %162 : vector<1x128xf32> to vector<128xf32>
    %164 = vector.shape_cast %161 : vector<128xf32> to vector<1x128xf32>
    tpu.vector_store %arg19[%c0_142, %c0_143], %164 {strides = array<i32>} : memref<4x128xf32, #tpu.memory_space<vmem>>, vector<1x128xf32>,
    %c2_144 = arith.constant 2 : index
    %c0_145 = arith.constant 0 : index
    %165 = vector.load %arg18[%c2_144, %c0_145] : memref<8x128xf32, #tpu.memory_space<vmem>>, vector<1x128xf32>
    %166 = vector.shape_cast %165 : vector<1x128xf32> to vector<128xf32>
    %c3_146 = arith.constant 3 : index
    %c0_147 = arith.constant 0 : index
    %167 = vector.load %arg18[%c3_146, %c0_147] : memref<8x128xf32, #tpu.memory_space<vmem>>, vector<1x128xf32>
    %168 = vector.shape_cast %167 : vector<1x128xf32> to vector<128xf32>
    %169 = arith.maximumf %166, %168 : vector<128xf32>
    %c1_148 = arith.constant 1 : index
    %c0_149 = arith.constant 0 : index
    %170 = vector.load %arg19[%c1_148, %c0_149] : memref<4x128xf32, #tpu.memory_space<vmem>>, vector<1x128xf32>
    %171 = vector.shape_cast %170 : vector<1x128xf32> to vector<128xf32>
    %172 = vector.shape_cast %169 : vector<128xf32> to vector<1x128xf32>
    tpu.vector_store %arg19[%c1_148, %c0_149], %172 {strides = array<i32>} : memref<4x128xf32, #tpu.memory_space<vmem>>, vector<1x128xf32>,
    %c4_150 = arith.constant 4 : index
    %c0_151 = arith.constant 0 : index
    %173 = vector.load %arg18[%c4_150, %c0_151] : memref<8x128xf32, #tpu.memory_space<vmem>>, vector<1x128xf32>
    %174 = vector.shape_cast %173 : vector<1x128xf32> to vector<128xf32>
    %c5_152 = arith.constant 5 : index
    %c0_153 = arith.constant 0 : index
    %175 = vector.load %arg18[%c5_152, %c0_153] : memref<8x128xf32, #tpu.memory_space<vmem>>, vector<1x128xf32>
    %176 = vector.shape_cast %175 : vector<1x128xf32> to vector<128xf32>
    %177 = arith.maximumf %174, %176 : vector<128xf32>
    %c2_154 = arith.constant 2 : index
    %c0_155 = arith.constant 0 : index
    %178 = vector.load %arg19[%c2_154, %c0_155] : memref<4x128xf32, #tpu.memory_space<vmem>>, vector<1x128xf32>
    %179 = vector.shape_cast %178 : vector<1x128xf32> to vector<128xf32>
    %180 = vector.shape_cast %177 : vector<128xf32> to vector<1x128xf32>
    tpu.vector_store %arg19[%c2_154, %c0_155], %180 {strides = array<i32>} : memref<4x128xf32, #tpu.memory_space<vmem>>, vector<1x128xf32>,
    %c6_156 = arith.constant 6 : index
    %c0_157 = arith.constant 0 : index
    %181 = vector.load %arg18[%c6_156, %c0_157] : memref<8x128xf32, #tpu.memory_space<vmem>>, vector<1x128xf32>
    %182 = vector.shape_cast %181 : vector<1x128xf32> to vector<128xf32>
    %c7_158 = arith.constant 7 : index
    %c0_159 = arith.constant 0 : index
    %183 = vector.load %arg18[%c7_158, %c0_159] : memref<8x128xf32, #tpu.memory_space<vmem>>, vector<1x128xf32>
    %184 = vector.shape_cast %183 : vector<1x128xf32> to vector<128xf32>
    %185 = arith.maximumf %182, %184 : vector<128xf32>
    %c3_160 = arith.constant 3 : index
    %c0_161 = arith.constant 0 : index
    %186 = vector.load %arg19[%c3_160, %c0_161] : memref<4x128xf32, #tpu.memory_space<vmem>>, vector<1x128xf32>
    %187 = vector.shape_cast %186 : vector<1x128xf32> to vector<128xf32>
    %188 = vector.shape_cast %185 : vector<128xf32> to vector<1x128xf32>
    tpu.vector_store %arg19[%c3_160, %c0_161], %188 {strides = array<i32>} : memref<4x128xf32, #tpu.memory_space<vmem>>, vector<1x128xf32>,
    %c0_162 = arith.constant 0 : index
    %c0_163 = arith.constant 0 : index
    %189 = vector.load %arg19[%c0_162, %c0_163] : memref<4x128xf32, #tpu.memory_space<vmem>>, vector<4x128xf32>
    %c0_164 = arith.constant 0 : index
    %c0_165 = arith.constant 0 : index
    %190 = vector.load %arg6[%c0_164, %c0_165] : memref<128x128xf32, #tpu.memory_space<vmem>>, vector<128x128xf32>
    %cst_166 = arith.constant dense<0.000000e+00> : vector<4x128xf32>
    %191 = tpu.matmul %189, %190, %cst_166 {dimension_numbers = #tpu.dot_dimension_numbers<[1], [0], [0], [1], [0, 0, 1, 1], [], []>} : vector<4x128xf32>, vector<128x128xf32>, vector<4x128xf32> -> vector<4x128xf32>
    %c0_167 = arith.constant 0 : index
    %c0_168 = arith.constant 0 : index
    %192 = vector.load %arg8[%c0_167, %c0_168] : memref<1x128xf32, #tpu.memory_space<vmem>>, vector<1x128xf32>
    %193 = vector.broadcast %192 : vector<1x128xf32> to vector<4x128xf32>
    %194 = arith.addf %191, %193 : vector<4x128xf32>
    %c0_169 = arith.constant 0 : index
    %c0_170 = arith.constant 0 : index
    %195 = vector.load %arg7[%c0_169, %c0_170] : memref<128x128xf32, #tpu.memory_space<vmem>>, vector<128x128xf32>
    %cst_171 = arith.constant dense<0.000000e+00> : vector<4x128xf32>
    %196 = tpu.matmul %189, %195, %cst_171 {dimension_numbers = #tpu.dot_dimension_numbers<[1], [0], [0], [1], [0, 0, 1, 1], [], []>} : vector<4x128xf32>, vector<128x128xf32>, vector<4x128xf32> -> vector<4x128xf32>
    %c0_172 = arith.constant 0 : index
    %c0_173 = arith.constant 0 : index
    %197 = vector.load %arg8[%c0_172, %c0_173] : memref<1x128xf32, #tpu.memory_space<vmem>>, vector<1x128xf32>
    %198 = vector.broadcast %197 : vector<1x128xf32> to vector<4x128xf32>
    %199 = arith.addf %196, %198 : vector<4x128xf32>
    %200 = tpu.iota {dimensions = array<i32: 0>} : vector<8x4xi32>
    %201 = tpu.iota {dimensions = array<i32: 1>} : vector<8x4xi32>
    %c2_i32 = arith.constant 2 : i32
    %202 = vector.broadcast %c2_i32 : i32 to vector<8x4xi32>
    %203 = arith.muli %202, %201 : vector<8x4xi32>
    %204 = arith.cmpi eq, %200, %203 : vector<8x4xi32>
    %cst_174 = arith.constant 1.000000e+00 : f32
    %cst_175 = arith.constant 0.000000e+00 : f32
    %205 = vector.broadcast %cst_174 : f32 to vector<8x4xf32>
    %206 = vector.broadcast %cst_175 : f32 to vector<8x4xf32>
    %207 = arith.select %204, %205, %206 : vector<8x4xi1>, vector<8x4xf32>
    %c2_i32_176 = arith.constant 2 : i32
    %208 = vector.broadcast %c2_i32_176 : i32 to vector<8x4xi32>
    %209 = arith.muli %208, %201 : vector<8x4xi32>
    %c1_i32 = arith.constant 1 : i32
    %210 = vector.broadcast %c1_i32 : i32 to vector<8x4xi32>
    %211 = arith.addi %209, %210 : vector<8x4xi32>
    %212 = arith.cmpi eq, %200, %211 : vector<8x4xi32>
    %cst_177 = arith.constant 1.000000e+00 : f32
    %cst_178 = arith.constant 0.000000e+00 : f32
    %213 = vector.broadcast %cst_177 : f32 to vector<8x4xf32>
    %214 = vector.broadcast %cst_178 : f32 to vector<8x4xf32>
    %215 = arith.select %212, %213, %214 : vector<8x4xi1>, vector<8x4xf32>
    %cst_179 = arith.constant dense<0.000000e+00> : vector<8x128xf32>
    %216 = tpu.matmul %207, %194, %cst_179 {dimension_numbers = #tpu.dot_dimension_numbers<[1], [0], [0], [1], [0, 0, 1, 1], [], []>} : vector<8x4xf32>, vector<4x128xf32>, vector<8x128xf32> -> vector<8x128xf32>
    %cst_180 = arith.constant dense<0.000000e+00> : vector<8x128xf32>
    %217 = tpu.matmul %215, %199, %cst_180 {dimension_numbers = #tpu.dot_dimension_numbers<[1], [0], [0], [1], [0, 0, 1, 1], [], []>} : vector<8x4xf32>, vector<4x128xf32>, vector<8x128xf32> -> vector<8x128xf32>
    %218 = arith.addf %216, %217 : vector<8x128xf32>
    %cst_181 = arith.constant 0.000000e+00 : f32
    %219 = vector.broadcast %cst_181 : f32 to vector<8x128xf32>
    %220 = arith.maximumf %218, %219 : vector<8x128xf32>
    %c0_182 = arith.constant 0 : index
    %c0_183 = arith.constant 0 : index
    %221 = vector.load %arg9[%c0_182, %c0_183] : memref<128x16xf32, #tpu.memory_space<vmem>>, vector<128x16xf32>
    %cst_184 = arith.constant dense<0.000000e+00> : vector<8x16xf32>
    %222 = tpu.matmul %220, %221, %cst_184 {dimension_numbers = #tpu.dot_dimension_numbers<[1], [0], [0], [1], [0, 0, 1, 1], [], []>} : vector<8x128xf32>, vector<128x16xf32>, vector<8x16xf32> -> vector<8x16xf32>
    %c0_185 = arith.constant 0 : index
    %c0_186 = arith.constant 0 : index
    %223 = vector.load %arg11[%c0_185, %c0_186] : memref<1x16xf32, #tpu.memory_space<vmem>>, vector<1x16xf32>
    %224 = vector.broadcast %223 : vector<1x16xf32> to vector<8x16xf32>
    %225 = arith.addf %222, %224 : vector<8x16xf32>
    %c0_187 = arith.constant 0 : index
    %c0_188 = arith.constant 0 : index
    %226 = vector.load %arg10[%c0_187, %c0_188] : memref<128x16xf32, #tpu.memory_space<vmem>>, vector<128x16xf32>
    %cst_189 = arith.constant dense<0.000000e+00> : vector<8x16xf32>
    %227 = tpu.matmul %220, %226, %cst_189 {dimension_numbers = #tpu.dot_dimension_numbers<[1], [0], [0], [1], [0, 0, 1, 1], [], []>} : vector<8x128xf32>, vector<128x16xf32>, vector<8x16xf32> -> vector<8x16xf32>
    %c0_190 = arith.constant 0 : index
    %c0_191 = arith.constant 0 : index
    %228 = vector.load %arg11[%c0_190, %c0_191] : memref<1x16xf32, #tpu.memory_space<vmem>>, vector<1x16xf32>
    %229 = vector.broadcast %228 : vector<1x16xf32> to vector<8x16xf32>
    %230 = arith.addf %227, %229 : vector<8x16xf32>
    %231 = tpu.iota {dimensions = array<i32: 0>} : vector<16x8xi32>
    %232 = tpu.iota {dimensions = array<i32: 1>} : vector<16x8xi32>
    %c2_i32_192 = arith.constant 2 : i32
    %233 = vector.broadcast %c2_i32_192 : i32 to vector<16x8xi32>
    %234 = arith.muli %233, %232 : vector<16x8xi32>
    %235 = arith.cmpi eq, %231, %234 : vector<16x8xi32>
    %cst_193 = arith.constant 1.000000e+00 : f32
    %cst_194 = arith.constant 0.000000e+00 : f32
    %236 = vector.broadcast %cst_193 : f32 to vector<16x8xf32>
    %237 = vector.broadcast %cst_194 : f32 to vector<16x8xf32>
    %238 = arith.select %235, %236, %237 : vector<16x8xi1>, vector<16x8xf32>
    %c2_i32_195 = arith.constant 2 : i32
    %239 = vector.broadcast %c2_i32_195 : i32 to vector<16x8xi32>
    %240 = arith.muli %239, %232 : vector<16x8xi32>
    %c1_i32_196 = arith.constant 1 : i32
    %241 = vector.broadcast %c1_i32_196 : i32 to vector<16x8xi32>
    %242 = arith.addi %240, %241 : vector<16x8xi32>
    %243 = arith.cmpi eq, %231, %242 : vector<16x8xi32>
    %cst_197 = arith.constant 1.000000e+00 : f32
    %cst_198 = arith.constant 0.000000e+00 : f32
    %244 = vector.broadcast %cst_197 : f32 to vector<16x8xf32>
    %245 = vector.broadcast %cst_198 : f32 to vector<16x8xf32>
    %246 = arith.select %243, %244, %245 : vector<16x8xi1>, vector<16x8xf32>
    %cst_199 = arith.constant dense<0.000000e+00> : vector<16x16xf32>
    %247 = tpu.matmul %238, %225, %cst_199 {dimension_numbers = #tpu.dot_dimension_numbers<[1], [0], [0], [1], [0, 0, 1, 1], [], []>} : vector<16x8xf32>, vector<8x16xf32>, vector<16x16xf32> -> vector<16x16xf32>
    %cst_200 = arith.constant dense<0.000000e+00> : vector<16x16xf32>
    %248 = tpu.matmul %246, %230, %cst_200 {dimension_numbers = #tpu.dot_dimension_numbers<[1], [0], [0], [1], [0, 0, 1, 1], [], []>} : vector<16x8xf32>, vector<8x16xf32>, vector<16x16xf32> -> vector<16x16xf32>
    %249 = arith.addf %247, %248 : vector<16x16xf32>
    %cst_201 = arith.constant 0.000000e+00 : f32
    %250 = vector.broadcast %cst_201 : f32 to vector<16x16xf32>
    %251 = arith.subf %250, %249 : vector<16x16xf32>
    %252 = math.exp %251 : vector<16x16xf32>
    %cst_202 = arith.constant 1.000000e+00 : f32
    %253 = vector.broadcast %cst_202 : f32 to vector<16x16xf32>
    %254 = arith.addf %253, %252 : vector<16x16xf32>
    %cst_203 = arith.constant 1.000000e+00 : f32
    %255 = vector.broadcast %cst_203 : f32 to vector<16x16xf32>
    %256 = arith.divf %255, %254 : vector<16x16xf32>
    %c0_204 = arith.constant 0 : index
    %c0_205 = arith.constant 0 : index
    %257 = vector.load %arg12[%c0_204, %c0_205] : memref<16x16xf32, #tpu.memory_space<vmem>>, vector<16x16xf32>
    tpu.vector_store %arg12[%c0_204, %c0_205], %256 {strides = array<i32>} : memref<16x16xf32, #tpu.memory_space<vmem>>, vector<16x16xf32>,
    return
  }
  func.func @transform_0(%arg0: i32) -> (i32, i32, i32) {
    %c0_i32 = arith.constant 0 : i32
    %c0_i32_0 = arith.constant 0 : i32
    %c0_i32_1 = arith.constant 0 : i32
    return %arg0, %c0_i32, %c0_i32_0 : i32, i32, i32
  }
  func.func @transform_1(%arg0: i32) -> (i32, i32) {
    %c0_i32 = arith.constant 0 : i32
    %c0_i32_0 = arith.constant 0 : i32
    %c0_i32_1 = arith.constant 0 : i32
    return %c0_i32, %c0_i32_0 : i32, i32
  }
  func.func @transform_2(%arg0: i32) -> (i32, i32) {
    %c0_i32 = arith.constant 0 : i32
    %c0_i32_0 = arith.constant 0 : i32
    %c0_i32_1 = arith.constant 0 : i32
    return %c0_i32, %c0_i32_0 : i32, i32
  }
  func.func @transform_3(%arg0: i32) -> (i32, i32) {
    %c0_i32 = arith.constant 0 : i32
    %c0_i32_0 = arith.constant 0 : i32
    %c0_i32_1 = arith.constant 0 : i32
    return %c0_i32, %c0_i32_0 : i32, i32
  }
  func.func @transform_4(%arg0: i32) -> (i32, i32) {
    %c0_i32 = arith.constant 0 : i32
    %c0_i32_0 = arith.constant 0 : i32
    %c0_i32_1 = arith.constant 0 : i32
    return %c0_i32, %c0_i32_0 : i32, i32
  }
  func.func @transform_5(%arg0: i32) -> (i32, i32) {
    %c0_i32 = arith.constant 0 : i32
    %c0_i32_0 = arith.constant 0 : i32
    %c0_i32_1 = arith.constant 0 : i32
    return %c0_i32, %c0_i32_0 : i32, i32
  }
  func.func @transform_6(%arg0: i32) -> (i32, i32) {
    %c0_i32 = arith.constant 0 : i32
    %c0_i32_0 = arith.constant 0 : i32
    %c0_i32_1 = arith.constant 0 : i32
    return %c0_i32, %c0_i32_0 : i32, i32
  }
  func.func @transform_7(%arg0: i32) -> (i32, i32) {
    %c0_i32 = arith.constant 0 : i32
    %c0_i32_0 = arith.constant 0 : i32
    %c0_i32_1 = arith.constant 0 : i32
    return %c0_i32, %c0_i32_0 : i32, i32
  }
  func.func @transform_8(%arg0: i32) -> (i32, i32) {
    %c0_i32 = arith.constant 0 : i32
    %c0_i32_0 = arith.constant 0 : i32
    %c0_i32_1 = arith.constant 0 : i32
    return %c0_i32, %c0_i32_0 : i32, i32
  }
  func.func @transform_9(%arg0: i32) -> (i32, i32) {
    %c0_i32 = arith.constant 0 : i32
    %c0_i32_0 = arith.constant 0 : i32
    %c0_i32_1 = arith.constant 0 : i32
    return %c0_i32, %c0_i32_0 : i32, i32
  }
  func.func @transform_10(%arg0: i32) -> (i32, i32) {
    %c0_i32 = arith.constant 0 : i32
    %c0_i32_0 = arith.constant 0 : i32
    %c0_i32_1 = arith.constant 0 : i32
    return %c0_i32, %c0_i32_0 : i32, i32
  }
  func.func @transform_11(%arg0: i32) -> (i32, i32) {
    %c0_i32 = arith.constant 0 : i32
    %c0_i32_0 = arith.constant 0 : i32
    return %arg0, %c0_i32 : i32, i32
  }
}

</mosaic_0001>

<bundles_post_ra>
// kernel: convnet_forward.1
= control target key start
LH: loop header
LB: loop body
LE: loop exit
PB: predicated region body
PF: predicated region fallthrough
CT: control target
= control target key end

     0   :  { %s2784_s0 = inlined_call_operand.hbm [shape: f32[2,16,16], index: 0, kind: input, shape index: {}]   ;;  %s2785_s1 = inlined_call_operand.hbm [shape: f32[54,256], index: 1, kind: input, shape index: {}]   ;;  %s2786_s2 = inlined_call_operand.vmem [shape: f32[1,256], index: 2, kind: input, shape index: {}]   ;;  %s2787_s3 = inlined_call_operand.hbm [shape: f32[480,256], index: 3, kind: input, shape index: {}]   ;;  %s2788_s4 = inlined_call_operand.vmem [shape: f32[1,256], index: 4, kind: input, shape index: {}]   ;;  %s2789_s5 = inlined_call_operand.vmem [shape: f32[128,128], index: 5, kind: input, shape index: {}]   ;;  %s2790_s6 = inlined_call_operand.vmem [shape: f32[128,128], index: 6, kind: input, shape index: {}]   ;;  %s2791_s7 = inlined_call_operand.vmem [shape: f32[1,128], index: 7, kind: input, shape index: {}]   ;;  %s2792_s8 = inlined_call_operand.vmem [shape: f32[128,16], index: 8, kind: input, shape index: {}]   ;;  %s2793_s9 = inlined_call_operand.vmem [shape: f32[128,16], index: 9, kind: input, shape index: {}]   ;;  %s2794_s10 = inlined_call_operand.vmem [shape: f32[1,16], index: 10, kind: input, shape index: {}]   ;;  %s2795_s11 = inlined_call_operand.hbm [shape: f32[32,16], index: 11, kind: output, shape index: {}]  }
   0x1   :  { %2799 = sst [smem:[#allocation22_spill]] %s2785_s1 }
   0x2   :  { %2800 = sst [smem:[#allocation23_spill]] %s2787_s3 }
   0x3   :  { %16 = vsyncpa [#allocation10], 0 }
   0x4   :  { %18 = vsyncpa [#allocation10 + $0x1], 0 }
   0x5   :  { %19 = vsyncpa [#allocation13], 0 }
   0x6   :  { %20 = vsyncpa [#allocation11], 0 }
   0x7   :  { %22 = vsyncpa [#allocation11 + $0x1], 0  ;;  %s2267_s17 = smov 0   ;;  %s2269_s18 = smov 0  }
   0x8   :  { %s2271_s19 = smov 0   ;;  %s2273_s20 = smov 0  }
   0x9 LB: > { %2801 = sst [smem:[#allocation19_spill]] %s2184_s19  ;;  %s2288_s21 = sadd.s32 4294967295, %s2188_s20   ;;  %s2188_s20 = sphi %s2273_s20, %s2812_s20   ;;  %s2184_s19 = sphi %s2271_s19, %s2814_s19   ;;  %s2180_s18 = sphi %s2269_s18, %s2816_s18   ;;  %s2176_s17 = sphi %s2267_s17, %s2815_s17  }
   0xa   : > { %s1884_s22 = sadd.s32 4294967294, %s2188_s20   ;;  %p48_p0 = scmp.ne.s32.totalorder %s2180_s18, %s2176_s17 }
   0xb   : > { %p49_p1 = scmp.eq.s32.totalorder %s2288_s21, 0  ;;  %p282_p2 = scmp.eq.s32.totalorder %s2288_s21, 1 }
   0xc   : > { %p288_p3 = scmp.eq.s32.totalorder %s1884_s22, 1  ;;  %p1885_p5 = scmp.ge.s32.totalorder %s2188_s20, 1 }
   0xd   : > { %p2297_p4 = por %p49_p1, %p48_p0  ;;  %p295_p7 = scmp.lt.s32.totalorder %s2188_s20, 3 }
   0xe   : > { %p2302_p6 = por %p288_p3, %p48_p0  ;;  %s2804_s1 = sld [smem:[#allocation22_spill]] }
   0xf   : > { %p2310_p8 = pnand %p1885_p5, %p295_p7  ;;  %s2190_s29 = smov [#allocation12]  }
  0x10   : > { %s308_s30 = sshll.u32 %s2190_s29, 4  ;;  %s2806_s3 = sld [smem:[#allocation23_spill]]  ;;  %s309_s30 = int_to_ptr.vmem [resolvable:$true] %s308_s30 }
  0x11   : > { %p1948_p9 = pneg %p2310_p8  ;;  %s2191_s15 = smov 256  }
  0x12   : > { %s2192_s16 = smov 16   ;;  %s2193_s22 = smov [#allocation14]  }
  0x13   : > { %p1949_p10 = pnand %p1948_p9, %p49_p1  ;;  %s325_s25 = sshll.u32 %s2193_s22, 4  ;;  %s326_s25 = int_to_ptr.vmem [resolvable:$true] %s325_s25 }
  0x14   : > { %s306_s27 = sshll.u32 %s2804_s1, 4  ;;  %s2323_s26 = sadd.s32 1, %s2188_s20   ;;  %s307_s27 = int_to_ptr.hbm [resolvable:$true] %s306_s27 }
  0x15   : > { %1951 = dma.hbm_to_vmem [thread:$0]  (!%p1949_p10), %s307_s27, 1792, %s309_s30, [#allocation13], %s2191_s15, %s2191_s15, %s2192_s16  }
  0x16   : > { %s323_s14 = sshll.u32 %s2806_s3, 4  ;;  %2807 = sst [smem:[#allocation20_spill]] %s2323_s26  ;;  %s324_s14 = int_to_ptr.hbm [resolvable:$true] %s323_s14 }
  0x17   : > { %1954 = dma.hbm_to_vmem [thread:$0]  (!%p1949_p10), %s324_s14, 15360, %s326_s25, [#allocation13], %s2191_s15, %s2191_s15, %s2192_s16  }
  0x18   : > { %s35_s29 = sadd.s32 1, %s2184_s19  ;;  %s32_s1 = ssub.s32 %s2188_s20, %s2323_s26 }
  0x19   : > { %p42_p12 = scmp.ne.s32.totalorder %s2184_s19, %s2180_s18  ;;  %p33_p13 = scmp.eq.s32.totalorder %s32_s1, 0 }
  0x1a   : > { %p43_p0 = scmp.eq.s32.totalorder %s2188_s20, 0  ;;  %p1965_p5 = scmp.lt.s32.totalorder %s2188_s20, 2 }
  0x1b   : > { %p2333_p3 = por %p282_p2, %p42_p12  ;;  %s360_s30 = sand.u32 1, %s2184_s19  }
  0x1c   : > { %s2339_s27 = scalar_select %p33_p13, %s2184_s19, %s35_s29  }
  0x1d   : > { %p44_p7 = por %p43_p0, %p42_p12  ;;  %s1889_s13 = sshll.u32 %s360_s30, 4 }
  0x1e   : > { %2809 = sst [smem:[#allocation21_spill]] %s2339_s27  ;;  %s1934_s14 = sshll.u32 %s2188_s20, 4 }
  0x1f   : > { %s369_s22 = scalar_lea.hbm %s2784_s0, %s1934_s14  ;;  %s364_s25 = scalar_lea.vmem [#allocation9], %s1889_s13 }
  0x20   : > { %s372_s3 = sshll.u32 %s364_s25, 4  ;;  %s370_s1 = sshll.u32 %s369_s22, 4  ;;  %s373_s3 = int_to_ptr.vmem [resolvable:$true] %s372_s3  ;;  %s371_s1 = int_to_ptr.hbm [resolvable:$true] %s370_s1 }
  0x21   : > { %p2346_p2 = pnand %p1965_p5, %p44_p7  ;;  %s361_s29 = scalar_lea.sflag [#allocation10], %s360_s30 }
  0x22   : > { %s2088_s27 = sshra.s32 %s371_s1, 4  ;;  %s2095_s15 = scalar_lea.hbm %s2784_s0, 32  ;;  %s2089_s27 = int_to_ptr.hbm [resolvable:$true] %s2088_s27 }
  0x23   : > { %s2090_s19 = scalar_lea.hbm %s2089_s27, 16  ;;  %p2092_p10 = pneg %p2346_p2 }
  0x24   : > { %p2091_p9 = scmp.ne.s32.totalorder %s2089_s27, %s2090_s19  ;;  %p2096_p0 = scmp.lt.s32.totalorder %s2089_s27, %s2784_s0 }
  0x25   : > { %p2097_p5 = scmp.lt.s32.totalorder %s2095_s15, %s2090_s19 }
  0x26   : > { %p2093_p12 = pnand %p2092_p10, %p2091_p9 }
  0x27   : > { %p2098_p7 = por %p2097_p5, %p2096_p0 }
  0x28   : > { %p2094_p13 = pneg %p2093_p12 }
  0x2a   : > { %p2099_p11 = pnand %p2098_p7, %p2094_p13 }
  0x2c   : > { %2102 = shalt.err (!%p2099_p11)
}
  0x2d   : > { %s2194_s30 = smov 128   ;;  %s2195_s25 = smov 8  }
  0x2e   : > { %1958 = dma.hbm_to_vmem [thread:$0]  (!%p2346_p2), %s371_s1, 256, %s373_s3, %s361_s29, %s2194_s30, %s2194_s30, %s2195_s25  }
  0x2f   : > { %384 = sbr.rel (%p2310_p8) target bundleno = 1733 (0x6c5), region = 64  ;;  %s2363_s14 = sand.u32 (!%p2310_p8), 1, %s2180_s18  }
  0x30   : > { %s1893_s27 = sshll.u32 (!%p2310_p8), %s2363_s14, 4  ;;  %s387_s19 = scalar_lea.sflag (!%p2310_p8), [#allocation10], %s2363_s14 }
  0x31   : > { %s390_s13 = scalar_lea.vmem (!%p2310_p8), [#allocation9], %s1893_s27 }
  0x34   : > { %2163 = dma.done.wait (%p2297_p4), %s387_s19, 256  }
  0x35   : > { %2165 = vsyncadd (%p2297_p4), %s387_s19, 4294967040 }
  0x36   : > { %2167 = dma.done.wait (%p49_p1), [#allocation13], 17152  }
  0x37   : > { %2169 = vsyncadd (%p49_p1), [#allocation13], 4294950144  ;;  %vm441_vm0 = vcmask 146432   ;;  %v2196_v0 = vmov 0.0   ;;  %v446_v1 = vld [vmem:[%s390_s13] sm:$0xff]  ;;  %s2197_s3 = smov 1  }
  0x38   : > { %442 = vst.msk [vmem:[#allocation2] sm:$0xff] %vm441_vm0, %v2196_v0  ;;  %450 = vrot.lane.b32.xlu0 %v446_v1, %s2197_s3  ;;  %v447_v2 = vld [vmem:[%s390_s13 + $0x8] sm:$0xff]  ;;  %v473_v3 = vld [vmem:[#allocation12 + $0x20] sm:$0x3]  ;;  %vm481_vm1 = vcmask 1041408   ;;  %v471_v5 = vld [vmem:[#allocation12 + $0x10] sm:$0xff] }
  0x39   : > { %443 = vst.msk [vmem:[#allocation2 + $0x8] sm:$0xff] %vm441_vm0, %v2196_v0  ;;  %v474_v4 = vld [vmem:[#allocation12 + $0x28] sm:$0x3]  ;;  %1897 = vmatpush.msk.msra.mxu0 %vm481_vm1, %v473_v3  ;;  %v544_v6 = vld [vmem:[#allocation12 + $0x40] sm:$0xf]  ;;  %v472_v8 = vld [vmem:[#allocation12 + $0x18] sm:$0xff] }
  0x3a   : > { %900 = vst [vmem:[#allocation5] sm:$0xff] %v2196_v0  ;;  %1900 = vmatpush.msk.msra.mxu1 %vm481_vm1, %v474_v4  ;;  %v545_v7 = vld [vmem:[#allocation12 + $0x48] sm:$0xf]  ;;  %vm552_vm2 = vcmask 1045504   ;;  %v559_v9 = vrot.slane %v544_v6, 2  ;;  %v542_v11 = vld [vmem:[#allocation12 + $0x30] sm:$0xff] }
  0x3b   : > { %903 = vst [vmem:[#allocation5 + $0x10] sm:$0x3] %v2196_v0  ;;  %v561_v10 = vrot.slane %v545_v7, 2  ;;  %v543_v12 = vld [vmem:[#allocation12 + $0x38] sm:$0xff]  ;;  %v469_v13 = vld [vmem:[#allocation12] sm:$0xff]  ;;  %vm444_vm3 = vcmask 140288   ;;  %502 = vmatpush.msra.mxu0 %v471_v5 }
  0x3c   : > { %525 = vmatpush.msra.mxu1 %v472_v8  ;;  %v554_v14 = vrot.slane %v542_v11, 2  ;;  %v557_v15 = vrot.slane %v543_v12, 2  ;;  %v470_v16 = vld [vmem:[#allocation12 + $0x8] sm:$0xff]  ;;  %v540_v17 = vld [vmem:[#allocation12 + $0x20] sm:$0xfc]  ;;  %1903 = vmatpush.msk.msra.mxu2 %vm481_vm1, %v559_v9  ;;  %v631_v28 = vld [vmem:[#allocation12 + $0x50] sm:$0xff] }
  0x3d   : > { %1906 = vmatpush.msk.msra.mxu3 %vm481_vm1, %v561_v10  ;;  %v553_v18 = vrot.slane %v540_v17, 2  ;;  %v541_v19 = vld [vmem:[#allocation12 + $0x28] sm:$0xfc]  ;;  %445 = vst.msk [vmem:[#allocation2 + $0x10] sm:$0x3] %vm444_vm3, %v2196_v0  ;;  %503 = vmatpush.msra.mxu0 %v469_v13  ;;  %vm641_vm4 = vcmask 1043456  }
  0x3e   : > { %v560_v20 = vsel %vm552_vm2, %v554_v14, %v559_v9  ;;  %v562_v21 = vsel %vm552_vm2, %v557_v15, %v561_v10  ;;  %526 = vmatpush.msra.mxu1 %v470_v16  ;;  %v556_v22 = vrot.slane %v541_v19, 2  ;;  %v633_v25 = vld [vmem:[#allocation12 + $0x60] sm:$0x3f]  ;;  %v634_v27 = vld [vmem:[#allocation12 + $0x68] sm:$0x3f]  ;;  %v632_v29 = vld [vmem:[#allocation12 + $0x58] sm:$0xff] }
  0x3f   : > { %591 = vmatpush.msra.mxu2 %v560_v20  ;;  %614 = vmatpush.msra.mxu3 %v562_v21  ;;  %v555_v23 = vsel %vm552_vm2, %v553_v18, %v554_v14  ;;  %v648_v26 = vrot.slane %v633_v25, 4  ;;  %v650_v30 = vrot.slane %v634_v27, 4  ;;  %v643_v31 = vrot.slane %v631_v28, 4  ;;  %v629_v33 = vld [vmem:[#allocation12 + $0x40] sm:$0xf0]  ;;  %s2198_s26 = smov 112  }
  0x40   : > { %452 = vrot.lane.b32.xlu0 %v447_v2, %s2197_s3  ;;  %v558_v24 = vsel %vm552_vm2, %v556_v22, %v557_v15  ;;  %v646_v32 = vrot.slane %v632_v29, 4  ;;  %v642_v34 = vrot.slane %v629_v33, 4  ;;  %v630_v35 = vld [vmem:[#allocation12 + $0x48] sm:$0xf0]  ;;  %vm456_vm5 = vcmask 138248   ;;  %s2199_s1 = smov 96  }
  0x41   : > { %592 = vmatpush.msra.mxu2 %v555_v23  ;;  %615 = vmatpush.msra.mxu3 %v558_v24  ;;  %v649_v36 = vsel %vm641_vm4, %v643_v31, %v648_v26  ;;  %v645_v38 = vrot.slane %v630_v35, 4  ;;  %v459_v51 = vld [vmem:[%s2786_s2] sm:$0x3]  ;;  %s2200_s29 = smov 80   ;;  %s2201_s15 = smov 32   ;;  %vm736_vm6 = vcmask 130048  }
  0x42   : > { %1909 = vmatpush.msk.msrb.mxu0 %vm481_vm1, %v648_v26  ;;  %1912 = vmatpush.msk.msrb.mxu1 %vm481_vm1, %v650_v30  ;;  %v651_v37 = vsel %vm641_vm4, %v646_v32, %v650_v30  ;;  %v644_v39 = vsel %vm641_vm4, %v642_v34, %v643_v31  ;;  %v461_v54 = vperm.slane %v459_v51, 0  ;;  %v462_v57 = vperm.slane %v459_v51, 1  ;;  %s2202_s16 = smov 64   ;;  %s2203_s22 = smov 48  }
  0x43   : > { %v647_v40 = vsel %vm641_vm4, %v645_v38, %v646_v32  ;;  %s2204_s30 = smov 16   ;;  %vm759_vm7 = vcmask 261248   ;;  %vm782_vm8 = vcmask 392448   ;;  %vm805_vm9 = vcmask 523648   ;;  %s1935_s23 = sshll.u32 %s2288_s21, 4 }
  0x44   : > { %680 = vmatpush.msrb.mxu0 %v649_v36  ;;  %703 = vmatpush.msrb.mxu1 %v651_v37  ;;  %vm828_vm10 = vcmask 654848   ;;  %vm851_vm11 = vcmask 786048   ;;  %vm874_vm12 = vcmask 917248   ;;  %vm901_vm13 = vcmask 261120   ;;  %s2138_s19 = scalar_lea.hbm %s2795_s11, 32 }
  0x45   : > { %902 = vst.msk [vmem:[#allocation5 + $0x8] sm:$0xff] %vm901_vm13, %v2196_v0  ;;  %vm897_vm14 = vcmask 1048448   ;;  %vm913_vm15 = vcmask 1040512   ;;  %vm904_vm1 = vcmask 254976   ;;  %vm1163_vm3 = vcmask 1046528  }
  0x46   : > { %681 = vmatpush.msrb.mxu0 %v644_v39  ;;  %704 = vmatpush.msrb.mxu1 %v647_v40  ;;  %905 = vst.msk [vmem:[#allocation5 + $0x18] sm:$0x3] %vm904_vm1, %v2196_v0 }
  0xaa   : > { %v451_v41 = vpop.permute.xlu0 %450 }
  0xab   : > { %457 = vst.msk [vmem:[#allocation2 + $0x1] sm:$0xff] %vm456_vm5, %v451_v41 }
  0xb2   : > { %v453_v42 = vpop.permute.xlu0 %452  ;;  %v467_v43 = vld [vmem:[#allocation2] sm:$0xff] }
  0xb3   : > { %v538_v44 = vld [vmem:[#allocation2 + $0x1] sm:$0xff]  ;;  %458 = vst.msk [vmem:[#allocation2 + $0x9] sm:$0xff] %vm456_vm5, %v453_v42  ;;  %1898 = vmatmul.msk.f32.vlgmr.msra.gmra.mxu0 %vm441_vm0, %v467_v43  ;;  %1901 = vmatmul.msk.f32.vlgmr.msra.gmra.mxu1 %vm441_vm0, %v467_v43  ;;  %vm1427_vm5 = vcmask 785920  }
  0xb4   : > { %1904 = vmatmul.msk.f32.vlgmr.msra.gmra.mxu2 %vm441_vm0, %v538_v44  ;;  %1907 = vmatmul.msk.f32.vlgmr.msra.gmra.mxu3 %vm441_vm0, %v538_v44 }
  0xba   : > { %v468_v45 = vld [vmem:[#allocation2 + $0x8] sm:$0xff] }
  0xbb   : > { %v539_v46 = vld [vmem:[#allocation2 + $0x9] sm:$0xff]  ;;  %1899 = vmatmul.msk.f32.gmra.mxu0 %vm441_vm0, %v468_v45  ;;  %1902 = vmatmul.msk.f32.gmra.mxu1 %vm441_vm0, %v468_v45 }
  0xbc   : > { %1905 = vmatmul.msk.f32.gmra.mxu2 %vm441_vm0, %v539_v46  ;;  %1908 = vmatmul.msk.f32.gmra.mxu3 %vm441_vm0, %v539_v46  ;;  %v627_v47 = vld [vmem:[#allocation2 + $0x2] sm:$0xff]  ;;  %v628_v48 = vld [vmem:[#allocation2 + $0xa] sm:$0xff] }
  0xc3   : > { %1910 = vmatmul.msk.f32.vlgmr.msrb.gmra.mxu0 %vm441_vm0, %v627_v47  ;;  %1913 = vmatmul.msk.f32.vlgmr.msrb.gmra.mxu1 %vm441_vm0, %v627_v47 }
  0xcb   : > { %1911 = vmatmul.msk.f32.gmra.mxu0 %vm441_vm0, %v628_v48  ;;  %1914 = vmatmul.msk.f32.gmra.mxu1 %vm441_vm0, %v628_v48  ;;  %vm915_vm0 = vcmask 122880  }
 0x130   : > { %v505_v49 = vpop.f32.mrf.mxu0  ;;  %v528_v50 = vpop.f32.mrf.mxu1 }
 0x131   : > { %v534_v56 = vadd.f32 %v505_v49, %v461_v54  ;;  %v535_v63 = vadd.f32 %v528_v50, %v462_v57 }
 0x137   : > { %v594_v55 = vpop.f32.mrf.mxu2  ;;  %v617_v59 = vpop.f32.mrf.mxu3 }
 0x138   : > { %v508_v52 = vpop.f32.mrf.mxu0  ;;  %v531_v53 = vpop.f32.mrf.mxu1  ;;  %v623_v58 = vadd.f32 %v594_v55, %v534_v56  ;;  %v624_v2 = vadd.f32 %v617_v59, %v535_v63  ;;  %v1149_v63 = vld [vmem:[#allocation14 + $0x230] sm:$0xff] }
 0x139   : > { %v536_v6 = vadd.f32 %v508_v52, %v461_v54  ;;  %v537_v7 = vadd.f32 %v531_v53, %v462_v57  ;;  %1173 = vmatpush.msra.mxu1 %v1149_v63  ;;  %v1123_v63 = vld [vmem:[#allocation14 + $0x160] sm:$0xff] }
 0x13f   : > { %v597_v4 = vpop.f32.mrf.mxu2  ;;  %v620_v5 = vpop.f32.mrf.mxu3 }
 0x140   : > { %v683_v60 = vpop.f32.mrf.mxu0  ;;  %v706_v62 = vpop.f32.mrf.mxu1  ;;  %v625_v11 = vadd.f32 %v597_v4, %v536_v6  ;;  %v626_v12 = vadd.f32 %v620_v5, %v537_v7  ;;  %v1014_v5 = vld [vmem:[#allocation14 + $0xc0] sm:$0xff]  ;;  %v1012_v6 = vld [vmem:[#allocation14 + $0xb0] sm:$0xff] }
 0x141   : > { %v712_v61 = vadd.f32 %v683_v60, %v623_v58  ;;  %v713_v3 = vadd.f32 %v706_v62, %v624_v2  ;;  %v1018_v62 = vld [vmem:[#allocation14 + $0xe0] sm:$0xff] }
 0x142   : > { %v1147_v2 = vld [vmem:[#allocation14 + $0x220] sm:$0xff] }
 0x143   : > { %v2413_v1 = vmax.f32 %v712_v61, 0.0  ;;  %v2421_v8 = vmax.f32 %v713_v3, 0.0  ;;  %v1020_v61 = vld [vmem:[#allocation14 + $0xf0] sm:$0xff]  ;;  %1174 = vmatpush.msra.mxu1 %v1147_v2  ;;  %v1010_v7 = vld [vmem:[#allocation14 + $0xa0] sm:$0xff]  ;;  %v1005_v2 = vld [vmem:[#allocation14 + $0x78] sm:$0xff] }
 0x144   : > { %1033 = vmatpush.msrb.mxu2 %v1020_v61  ;;  %v1148_v61 = vld [vmem:[#allocation14 + $0x228] sm:$0xff] }
 0x145   : > { %789 = vrot.lane.b32.xlu0 %v2413_v1, %s2198_s26  ;;  %766 = vrot.lane.b32.xlu2 %v2413_v1, %s2198_s26 }
 0x146   : > { %743 = vrot.lane.b32.xlu1 %v2413_v1, %s2198_s26  ;;  %1034 = vmatpush.msrb.mxu2 %v1018_v62  ;;  %v1007_v62 = vld [vmem:[#allocation14 + $0x88] sm:$0xff] }
 0x148   : > { %v686_v9 = vpop.f32.mrf.mxu0  ;;  %v709_v10 = vpop.f32.mrf.mxu1 }
 0x149   : > { %v714_v13 = vadd.f32 %v686_v9, %v625_v11  ;;  %v715_v14 = vadd.f32 %v709_v10, %v626_v12 }
 0x14b   : > { %v718_v15 = vmax.f32 %v714_v13, 0.0  ;;  %v719_v16 = vmax.f32 %v715_v14, 0.0 }
 0x14d   : > { %858 = vrot.lane.b32.xlu0 %v2421_v8, %s2198_s26  ;;  %812 = vrot.lane.b32.xlu2 %v2421_v8, %s2198_s26 }
 0x14e   : > { %835 = vrot.lane.b32.xlu1 %v2421_v8, %s2198_s26 }
 0x155   : > { %814 = vrot.lane.b32.xlu0 %v719_v16, %s2198_s26  ;;  %768 = vrot.lane.b32.xlu2 %v718_v15, %s2198_s26 }
 0x156   : > { %745 = vrot.lane.b32.xlu1 %v718_v15, %s2198_s26 }
 0x15d   : > { %883 = vrot.lane.b32.xlu0 %v719_v16, %s2198_s26  ;;  %837 = vrot.lane.b32.xlu2 %v719_v16, %s2198_s26 }
 0x15e   : > { %791 = vrot.lane.b32.xlu1 %v718_v15, %s2198_s26 }
 0x165   : > { %881 = vrot.lane.b32.xlu2 %v2421_v8, %s2198_s26 }
 0x166   : > { %860 = vrot.lane.b32.xlu1 %v719_v16, %s2198_s26 }
 0x16d   : > { %730 = vrot.lane.b32.xlu2 %v718_v15, %s2198_s26 }
 0x16e   : > { %728 = vrot.lane.b32.xlu1 %v2413_v1, %s2198_s26 }
 0x19f   : > { %v767_v17 = vpop.permute.xlu2 %766 }
 0x1a0   : > { %v772_v18 = vmax.f32 %v2413_v1, %v767_v17 }
 0x1a2   : > { %776 = vrot.lane.b32.xlu2 %v772_v18, %s2199_s1 }
 0x1a7   : > { %v813_v19 = vpop.permute.xlu2 %812 }
 0x1a8   : > { %v818_v30 = vmax.f32 %v2421_v8, %v813_v19 }
 0x1af   : > { %v769_v20 = vpop.permute.xlu2 %768 }
 0x1b0   : > { %v773_v35 = vmax.f32 %v718_v15, %v769_v20 }
 0x1b7   : > { %v790_v21 = vpop.permute.xlu0 %789  ;;  %v838_v22 = vpop.permute.xlu2 %837 }
 0x1b8   : > { %v795_v23 = vmax.f32 %v2413_v1, %v790_v21  ;;  %v744_v24 = vpop.permute.xlu1 %743  ;;  %v842_v39 = vmax.f32 %v719_v16, %v838_v22 }
 0x1b9   : > { %v749_v25 = vmax.f32 %v2413_v1, %v744_v24 }
 0x1ba   : > { %799 = vrot.lane.b32.xlu1 %v795_v23, %s2200_s29 }
 0x1bb   : > { %753 = vrot.lane.b32.xlu0 %v749_v25, %s2198_s26 }
 0x1bf   : > { %v859_v26 = vpop.permute.xlu0 %858  ;;  %v882_v27 = vpop.permute.xlu2 %881 }
 0x1c0   : > { %v864_v28 = vmax.f32 %v2421_v8, %v859_v26  ;;  %v836_v29 = vpop.permute.xlu1 %835  ;;  %v887_v44 = vmax.f32 %v2421_v8, %v882_v27 }
 0x1c1   : > { %v841_v31 = vmax.f32 %v2421_v8, %v836_v29 }
 0x1c2   : > { %868 = vrot.lane.b32.xlu1 %v864_v28, %s2201_s15 }
 0x1c3   : > { %822 = vrot.lane.b32.xlu0 %v818_v30, %s2202_s16  ;;  %845 = vrot.lane.b32.xlu2 %v841_v31, %s2203_s22 }
 0x1c7   : > { %v731_v32 = vpop.permute.xlu2 %730  ;;  %v815_v37 = vpop.permute.xlu0 %814 }
 0x1c8   : > { %v735_v33 = vmax.f32 %v718_v15, %v731_v32  ;;  %v746_v34 = vpop.permute.xlu1 %745  ;;  %v819_v40 = vmax.f32 %v719_v16, %v815_v37  ;;  %v1008_v32 = vld [vmem:[#allocation14 + $0x90] sm:$0xff] }
 0x1c9   : > { %v750_v36 = vmax.f32 %v718_v15, %v746_v34  ;;  %v1006_v34 = vld [vmem:[#allocation14 + $0x80] sm:$0xff]  ;;  %v1141_v37 = vld [vmem:[#allocation14 + $0x1f0] sm:$0xff] }
 0x1ca   : > { %738 = vst.msk [vmem:[#allocation4 + $0x8] sm:$0xff] %vm736_vm6, %v735_v33  ;;  %v1145_v33 = vld [vmem:[#allocation14 + $0x210] sm:$0xff] }
 0x1cb   : > { %778 = vrot.lane.b32.xlu0 %v773_v35, %s2199_s1  ;;  %755 = vrot.lane.b32.xlu1 %v750_v36, %s2198_s26  ;;  %v1143_v35 = vld [vmem:[#allocation14 + $0x200] sm:$0xff]  ;;  %v1004_v36 = vld [vmem:[#allocation14 + $0x70] sm:$0xff] }
 0x1cc   : > { %1175 = vmatpush.msra.mxu1 %v1145_v33  ;;  %v1025_v33 = vld [vmem:[#allocation14 + $0x118] sm:$0xff] }
 0x1ce   : > { %1176 = vmatpush.msra.mxu1 %v1143_v35  ;;  %v1278_v35 = vld [vmem:[#allocation14 + $0x318] sm:$0xff] }
 0x1cf   : > { %v884_v42 = vpop.permute.xlu0 %883 }
 0x1d0   : > { %v792_v38 = vpop.permute.xlu1 %791  ;;  %v888_v45 = vmax.f32 %v719_v16, %v884_v42  ;;  %1177 = vmatpush.msra.mxu1 %v1141_v37  ;;  %v1137_v42 = vld [vmem:[#allocation14 + $0x1d0] sm:$0xff]  ;;  %v1128_v37 = vld [vmem:[#allocation14 + $0x188] sm:$0xff] }
 0x1d1   : > { %v796_v41 = vmax.f32 %v718_v15, %v792_v38  ;;  %v1002_v38 = vld [vmem:[#allocation14 + $0x60] sm:$0xff] }
 0x1d3   : > { %847 = vrot.lane.b32.xlu0 %v842_v39, %s2203_s22  ;;  %824 = vrot.lane.b32.xlu1 %v819_v40, %s2202_s16  ;;  %v1139_v39 = vld [vmem:[#allocation14 + $0x1e0] sm:$0xff]  ;;  %v1000_v40 = vld [vmem:[#allocation14 + $0x50] sm:$0xff] }
 0x1d4   : > { %801 = vrot.lane.b32.xlu2 %v796_v41, %s2200_s29  ;;  %1178 = vmatpush.msra.mxu1 %v1139_v39  ;;  %v1021_v41 = vld [vmem:[#allocation14 + $0xf8] sm:$0xff]  ;;  %s1788_s29 = scalar_lea.hbm %s2795_s11, %s1935_s23 }
 0x1d5   : > { %1073 = vmatpush.msra.mxu0 %v1021_v41  ;;  %v1126_v39 = vld [vmem:[#allocation14 + $0x178] sm:$0xff] }
 0x1d6   : > { %1179 = vmatpush.msra.mxu1 %v1137_v42  ;;  %v1274_v41 = vld [vmem:[#allocation14 + $0x2f8] sm:$0xff] }
 0x1d8   : > { %v861_v43 = vpop.permute.xlu1 %860 }
 0x1d9   : > { %v865_v46 = vmax.f32 %v719_v16, %v861_v43  ;;  %v998_v43 = vld [vmem:[#allocation14 + $0x40] sm:$0xff] }
 0x1db   : > { %891 = vrot.lane.b32.xlu0 %v887_v44, %s2204_s30  ;;  %893 = vrot.lane.b32.xlu1 %v888_v45, %s2204_s30  ;;  %v1019_v44 = vld [vmem:[#allocation14 + $0xe8] sm:$0xff]  ;;  %v1135_v45 = vld [vmem:[#allocation14 + $0x1c0] sm:$0xff] }
 0x1dc   : > { %870 = vrot.lane.b32.xlu2 %v865_v46, %s2201_s15  ;;  %v996_v46 = vld [vmem:[#allocation14 + $0x30] sm:$0xff]  ;;  %1074 = vmatpush.msra.mxu0 %v1019_v44  ;;  %v1295_v44 = vld [vmem:[#allocation14 + $0x3a0] sm:$0xff] }
 0x1dd   : > { %1180 = vmatpush.msra.mxu1 %v1135_v45  ;;  %v1272_v45 = vld [vmem:[#allocation14 + $0x2e8] sm:$0xff] }
 0x1e0   : > { %v729_v47 = vpop.permute.xlu1 %728 }
 0x1e1   : > { %v734_v48 = vmax.f32 %v2413_v1, %v729_v47  ;;  %v1016_v1 = vld [vmem:[#allocation14 + $0xd0] sm:$0xff]  ;;  %v1017_v47 = vld [vmem:[#allocation14 + $0xd8] sm:$0xff] }
 0x1e2   : > { %1035 = vmatpush.msrb.mxu2 %v1016_v1  ;;  %1075 = vmatpush.msra.mxu0 %v1017_v47  ;;  %v1146_v1 = vld [vmem:[#allocation14 + $0x218] sm:$0xff]  ;;  %v1293_v47 = vld [vmem:[#allocation14 + $0x390] sm:$0xff] }
 0x1e3   : > { %737 = vst.msk [vmem:[#allocation4] sm:$0xff] %vm736_vm6, %v734_v48  ;;  %v1133_v48 = vld [vmem:[#allocation14 + $0x1b0] sm:$0xff] }
 0x1e4   : > { %1036 = vmatpush.msrb.mxu2 %v1014_v5  ;;  %1181 = vmatpush.msra.mxu1 %v1133_v48  ;;  %v1003_v5 = vld [vmem:[#allocation14 + $0x68] sm:$0xff]  ;;  %v1270_v48 = vld [vmem:[#allocation14 + $0x2d8] sm:$0xff] }
 0x1e6   : > { %1037 = vmatpush.msrb.mxu2 %v1012_v6  ;;  %v1119_v6 = vld [vmem:[#allocation14 + $0x140] sm:$0xff] }
 0x1e8   : > { %1038 = vmatpush.msrb.mxu2 %v1010_v7  ;;  %v1028_v7 = vld [vmem:[#allocation14 + $0x130] sm:$0xff] }
 0x1e9   : > { %1065 = vmatpush.msrb.mxu3 %v1028_v7 }
 0x1ea   : > { %1039 = vmatpush.msrb.mxu2 %v1008_v32  ;;  %v991_v32 = vld [vmem:[#allocation14 + $0x8] sm:$0xff] }
 0x1ec   : > { %1040 = vmatpush.msrb.mxu2 %v1006_v34  ;;  %v1130_v34 = vld [vmem:[#allocation14 + $0x198] sm:$0xff] }
 0x1ee   : > { %1041 = vmatpush.msrb.mxu2 %v1004_v36  ;;  %v1023_v36 = vld [vmem:[#allocation14 + $0x108] sm:$0xff] }
 0x1f0   : > { %1042 = vmatpush.msrb.mxu2 %v1002_v38  ;;  %v1276_v38 = vld [vmem:[#allocation14 + $0x308] sm:$0xff] }
 0x1f2   : > { %1043 = vmatpush.msrb.mxu2 %v1000_v40  ;;  %v1297_v40 = vld [vmem:[#allocation14 + $0x3b0] sm:$0xff] }
 0x1f4   : > { %1044 = vmatpush.msrb.mxu2 %v998_v43  ;;  %v1124_v43 = vld [vmem:[#allocation14 + $0x168] sm:$0xff] }
 0x1f6   : > { %1045 = vmatpush.msrb.mxu2 %v996_v46  ;;  %v1122_v46 = vld [vmem:[#allocation14 + $0x158] sm:$0xff] }
 0x1fc   : > { %v777_v49 = vpop.permute.xlu2 %776 }
 0x21d   : > { %v846_v52 = vpop.permute.xlu2 %845 }
 0x22c   : > { %v800_v50 = vpop.permute.xlu1 %799 }
 0x22d   : > { %v754_v51 = vpop.permute.xlu0 %753 }
 0x22e   : > { %760 = vst.msk [vmem:[#allocation4] sm:$0xff] %vm759_vm7, %v754_v51  ;;  %v802_v55 = vpop.permute.xlu2 %801  ;;  %v1131_v51 = vld [vmem:[#allocation14 + $0x1a0] sm:$0xff] }
 0x22f   : > { %783 = vst.msk [vmem:[#allocation4] sm:$0xff] %vm782_vm8, %v777_v49  ;;  %v994_v49 = vld [vmem:[#allocation14 + $0x20] sm:$0xff]  ;;  %1182 = vmatpush.msra.mxu1 %v1131_v51  ;;  %v1268_v51 = vld [vmem:[#allocation14 + $0x2c8] sm:$0xff] }
 0x230   : > { %806 = vst.msk [vmem:[#allocation4] sm:$0xff] %vm805_vm9, %v800_v50  ;;  %v1015_v50 = vld [vmem:[#allocation14 + $0xc8] sm:$0xff]  ;;  %1046 = vmatpush.msrb.mxu2 %v994_v49 }
 0x231   : > { %1076 = vmatpush.msra.mxu0 %v1015_v50  ;;  %v1120_v49 = vld [vmem:[#allocation14 + $0x148] sm:$0xff]  ;;  %v1291_v50 = vld [vmem:[#allocation14 + $0x380] sm:$0xff] }
 0x234   : > { %v869_v53 = vpop.permute.xlu1 %868 }
 0x235   : > { %v823_v54 = vpop.permute.xlu0 %822 }
 0x236   : > { %829 = vst.msk [vmem:[#allocation4] sm:$0xff] %vm828_vm10, %v823_v54  ;;  %v871_v60 = vpop.permute.xlu2 %870  ;;  %v1129_v54 = vld [vmem:[#allocation14 + $0x190] sm:$0xff] }
 0x237   : > { %852 = vst.msk [vmem:[#allocation4] sm:$0xff] %vm851_vm11, %v846_v52  ;;  %v992_v52 = vld [vmem:[#allocation14 + $0x10] sm:$0xff]  ;;  %1183 = vmatpush.msra.mxu1 %v1129_v54 }
 0x238   : > { %875 = vst.msk [vmem:[#allocation4] sm:$0xff] %vm874_vm12, %v869_v53  ;;  %v1013_v53 = vld [vmem:[#allocation14 + $0xb8] sm:$0xff]  ;;  %1047 = vmatpush.msrb.mxu2 %v992_v52 }
 0x239   : > { %1077 = vmatpush.msra.mxu0 %v1013_v53  ;;  %v1266_v52 = vld [vmem:[#allocation14 + $0x2b8] sm:$0xff] }
 0x23d   : > { %v779_v56 = vpop.permute.xlu0 %778  ;;  %v756_v57 = vpop.permute.xlu1 %755 }
 0x23e   : > { %761 = vst.msk [vmem:[#allocation4 + $0x8] sm:$0xff] %vm759_vm7, %v756_v57  ;;  %v1127_v57 = vld [vmem:[#allocation14 + $0x180] sm:$0xff]  ;;  %vm1439_vm7 = vcmask 1048320  }
 0x23f   : > { %784 = vst.msk [vmem:[#allocation4 + $0x8] sm:$0xff] %vm782_vm8, %v779_v56  ;;  %v1011_v56 = vld [vmem:[#allocation14 + $0xa8] sm:$0xff]  ;;  %1184 = vmatpush.msra.mxu1 %v1127_v57 }
 0x240   : > { %807 = vst.msk [vmem:[#allocation4 + $0x8] sm:$0xff] %vm805_vm9, %v802_v55  ;;  %v990_v55 = vld [vmem:[#allocation14] sm:$0xff]  ;;  %1078 = vmatpush.msra.mxu0 %v1011_v56  ;;  %v1262_v56 = vld [vmem:[#allocation14 + $0x298] sm:$0xff]  ;;  %v1260_v57 = vld [vmem:[#allocation14 + $0x288] sm:$0xff]  ;;  %vm1544_vm9 = vcmask 31744  }
 0x241   : > { %1048 = vmatpush.msrb.mxu2 %v990_v55  ;;  %v1264_v55 = vld [vmem:[#allocation14 + $0x2a8] sm:$0xff] }
 0x245   : > { %v848_v58 = vpop.permute.xlu0 %847  ;;  %v825_v59 = vpop.permute.xlu1 %824 }
 0x246   : > { %830 = vst.msk [vmem:[#allocation4 + $0x8] sm:$0xff] %vm828_vm10, %v825_v59  ;;  %v1009_v59 = vld [vmem:[#allocation14 + $0x98] sm:$0xff] }
 0x247   : > { %853 = vst.msk [vmem:[#allocation4 + $0x8] sm:$0xff] %vm851_vm11, %v848_v58  ;;  %v1150_v58 = vld [vmem:[#allocation14 + $0x238] sm:$0xff]  ;;  %1079 = vmatpush.msra.mxu0 %v1009_v59 }
 0x248   : > { %876 = vst.msk [vmem:[#allocation4 + $0x8] sm:$0xff] %vm874_vm12, %v871_v60  ;;  %v1125_v60 = vld [vmem:[#allocation14 + $0x170] sm:$0xff]  ;;  %1213 = vmatpush.msra.mxu2 %v1150_v58 }
 0x249   : > { %1185 = vmatpush.msra.mxu1 %v1125_v60  ;;  %1080 = vmatpush.msra.mxu0 %v1007_v62  ;;  %v1298_v60 = vld [vmem:[#allocation14 + $0x3b8] sm:$0xff] }
 0x24a   : > { %1214 = vmatpush.msra.mxu2 %v1148_v61 }
 0x24b   : > { %1186 = vmatpush.msra.mxu1 %v1123_v63  ;;  %1081 = vmatpush.msra.mxu0 %v1005_v2  ;;  %v1157_v63 = vld [vmem:[#allocation14 + $0x270] sm:$0xff] }
 0x24c   : > { %1215 = vmatpush.msra.mxu2 %v1146_v1  ;;  %v1296_v1 = vld [vmem:[#allocation14 + $0x3a8] sm:$0xff] }
 0x24d   : > { %v892_v3 = vpop.permute.xlu0 %891  ;;  %v894_v4 = vpop.permute.xlu1 %893  ;;  %1082 = vmatpush.msra.mxu0 %v1003_v5  ;;  %v1153_v5 = vld [vmem:[#allocation14 + $0x250] sm:$0xff] }
 0x24e   : > { %898 = vst.msk [vmem:[#allocation4] sm:$0xff] %vm897_vm14, %v892_v3  ;;  %v1121_v3 = vld [vmem:[#allocation14 + $0x150] sm:$0xff] }
 0x24f   : > { %899 = vst.msk [vmem:[#allocation4 + $0x8] sm:$0xff] %vm897_vm14, %v894_v4  ;;  %v1144_v4 = vld [vmem:[#allocation14 + $0x208] sm:$0xff]  ;;  %1187 = vmatpush.msra.mxu1 %v1121_v3  ;;  %v1155_v3 = vld [vmem:[#allocation14 + $0x260] sm:$0xff] }
 0x250   : > { %1216 = vmatpush.msra.mxu2 %v1144_v4  ;;  %v1294_v4 = vld [vmem:[#allocation14 + $0x398] sm:$0xff] }
 0x251   : > { %1188 = vmatpush.msra.mxu1 %v1119_v6  ;;  %v1292_v6 = vld [vmem:[#allocation14 + $0x388] sm:$0xff] }
 0x255   : > { %v926_v8 = vld [vmem:[#allocation4 + $0x4] sm:$0x1]  ;;  %v927_v9 = vld [vmem:[#allocation4 + $0x5] sm:$0x1]  ;;  %v917_v10 = vld [vmem:[#allocation4 + $0x2] sm:$0x1] }
 0x256   : > { %v928_v11 = vmax.f32 %v926_v8, %v927_v9  ;;  %v918_v12 = vld [vmem:[#allocation4 + $0x3] sm:$0x1]  ;;  %v906_v13 = vld [vmem:[#allocation4] sm:$0x1]  ;;  %v907_v14 = vld [vmem:[#allocation4 + $0x1] sm:$0x1] }
 0x257   : > { %v919_v15 = vmax.f32 %v917_v10, %v918_v12  ;;  %v908_v16 = vmax.f32 %v906_v13, %v907_v14  ;;  %v935_v17 = vld [vmem:[#allocation4 + $0x6] sm:$0x1]  ;;  %v953_v18 = vld [vmem:[#allocation4 + $0xa] sm:$0x1]  ;;  %v954_v19 = vld [vmem:[#allocation4 + $0xb] sm:$0x1] }
 0x258   : > { %930 = vrot.lane.b32.xlu1 %v928_v11, %s2204_s30  ;;  %v936_v20 = vld [vmem:[#allocation4 + $0x7] sm:$0x1]  ;;  %v944_v21 = vld [vmem:[#allocation4 + $0x8] sm:$0x1]  ;;  %v945_v22 = vld [vmem:[#allocation4 + $0x9] sm:$0x1]  ;;  %v955_v23 = vmax.f32 %v953_v18, %v954_v19 }
 0x259   : > { %921 = vrot.lane.b32.xlu0 %v919_v15, %s2204_s30  ;;  %910 = vrot.lane.b32.xlu2 %v908_v16, %s2204_s30  ;;  %v937_v24 = vmax.f32 %v935_v17, %v936_v20  ;;  %v946_v25 = vmax.f32 %v944_v21, %v945_v22  ;;  %v962_v26 = vld [vmem:[#allocation4 + $0xc] sm:$0x1]  ;;  %v963_v27 = vld [vmem:[#allocation4 + $0xd] sm:$0x1]  ;;  %v971_v28 = vld [vmem:[#allocation4 + $0xe] sm:$0x1] }
 0x25a   : > { %v972_v29 = vld [vmem:[#allocation4 + $0xf] sm:$0x1]  ;;  %v964_v30 = vmax.f32 %v962_v26, %v963_v27  ;;  %v1142_v8 = vld [vmem:[#allocation14 + $0x1f8] sm:$0xff]  ;;  %v1140_v12 = vld [vmem:[#allocation14 + $0x1e8] sm:$0xff] }
 0x25b   : > { %v973_v31 = vmax.f32 %v971_v28, %v972_v29  ;;  %v1290_v9 = vld [vmem:[#allocation14 + $0x378] sm:$0xff]  ;;  %v1026_v11 = vld [vmem:[#allocation14 + $0x120] sm:$0xff]  ;;  %v1288_v13 = vld [vmem:[#allocation14 + $0x368] sm:$0xff]  ;;  %1217 = vmatpush.msra.mxu2 %v1142_v8 }
 0x25c   : > { %v1001_v10 = vld [vmem:[#allocation14 + $0x58] sm:$0xff]  ;;  %1352 = vmatpush.msrb.mxu1 %v1290_v9  ;;  %v999_v15 = vld [vmem:[#allocation14 + $0x48] sm:$0xff]  ;;  %1066 = vmatpush.msrb.mxu3 %v1026_v11  ;;  %v1024_v16 = vld [vmem:[#allocation14 + $0x110] sm:$0xff] }
 0x25d   : > { %1083 = vmatpush.msra.mxu0 %v1001_v10  ;;  %1218 = vmatpush.msra.mxu2 %v1140_v12  ;;  %v1138_v17 = vld [vmem:[#allocation14 + $0x1d8] sm:$0xff]  ;;  %v1022_v20 = vld [vmem:[#allocation14 + $0x100] sm:$0xff]  ;;  %v1136_v21 = vld [vmem:[#allocation14 + $0x1c8] sm:$0xff] }
 0x25e   : > { %1353 = vmatpush.msrb.mxu1 %v1288_v13  ;;  %v1286_v18 = vld [vmem:[#allocation14 + $0x358] sm:$0xff]  ;;  %1067 = vmatpush.msrb.mxu3 %v1024_v16  ;;  %v1284_v22 = vld [vmem:[#allocation14 + $0x348] sm:$0xff]  ;;  %v1151_v8 = vld [vmem:[#allocation14 + $0x240] sm:$0xff] }
 0x25f   : > { %1084 = vmatpush.msra.mxu0 %v999_v15  ;;  %1219 = vmatpush.msra.mxu2 %v1138_v17  ;;  %v997_v19 = vld [vmem:[#allocation14 + $0x38] sm:$0xff]  ;;  %v1027_v28 = vld [vmem:[#allocation14 + $0x128] sm:$0xff] }
 0x260   : > { %957 = vrot.lane.b32.xlu1 %v955_v23, %s2204_s30  ;;  %1354 = vmatpush.msrb.mxu1 %v1286_v18  ;;  %v995_v23 = vld [vmem:[#allocation14 + $0x28] sm:$0xff]  ;;  %v1282_v26 = vld [vmem:[#allocation14 + $0x338] sm:$0xff] }
 0x261   : > { %939 = vrot.lane.b32.xlu2 %v937_v24, %s2204_s30  ;;  %948 = vrot.lane.b32.xlu0 %v946_v25, %s2204_s30  ;;  %v1029_v24 = vld [vmem:[#allocation14 + $0x138] sm:$0xff]  ;;  %v1132_v29 = vld [vmem:[#allocation14 + $0x1a8] sm:$0xff] }
 0x262   : > { %1085 = vmatpush.msra.mxu0 %v997_v19  ;;  %1068 = vmatpush.msrb.mxu3 %v1022_v20  ;;  %v1134_v25 = vld [vmem:[#allocation14 + $0x1b8] sm:$0xff]  ;;  %v1156_v18 = vld [vmem:[#allocation14 + $0x268] sm:$0xff] }
 0x263   : > { %1220 = vmatpush.msra.mxu2 %v1136_v21  ;;  %v993_v27 = vld [vmem:[#allocation14 + $0x18] sm:$0xff]  ;;  %1355 = vmatpush.msrb.mxu1 %v1284_v22 }
 0x264   : > { %1086 = vmatpush.msra.mxu0 %v995_v23  ;;  %1105 = vmatpush.msra.mxu3 %v1029_v24  ;;  %v1158_v11 = vld [vmem:[#allocation14 + $0x278] sm:$0xff] }
 0x265   : > { %1221 = vmatpush.msra.mxu2 %v1134_v25  ;;  %1356 = vmatpush.msrb.mxu1 %v1282_v26  ;;  %v1154_v22 = vld [vmem:[#allocation14 + $0x258] sm:$0xff]  ;;  %v1152_v26 = vld [vmem:[#allocation14 + $0x248] sm:$0xff] }
 0x266   : > { %1087 = vmatpush.msra.mxu0 %v993_v27  ;;  %1106 = vmatpush.msra.mxu3 %v1027_v28 }
 0x267   : > { %1222 = vmatpush.msra.mxu2 %v1132_v29  ;;  %v1289_v29 = vld [vmem:[#allocation14 + $0x370] sm:$0xff] }
 0x268   : > { %1088 = vmatpush.msra.mxu0 %v991_v32  ;;  %1107 = vmatpush.msra.mxu3 %v1025_v33  ;;  %v1287_v32 = vld [vmem:[#allocation14 + $0x360] sm:$0xff] }
 0x269   : > { %966 = vrot.lane.b32.xlu2 %v964_v30, %s2204_s30  ;;  %975 = vrot.lane.b32.xlu0 %v973_v31, %s2204_s30  ;;  %v1280_v31 = vld [vmem:[#allocation14 + $0x328] sm:$0xff] }
 0x26a   : > { %1357 = vmatpush.msrb.mxu1 %v1280_v31  ;;  %1223 = vmatpush.msra.mxu2 %v1130_v34  ;;  %v1285_v34 = vld [vmem:[#allocation14 + $0x350] sm:$0xff] }
 0x26b   : > { %1108 = vmatpush.msra.mxu3 %v1023_v36  ;;  %1344 = vmatpush.msrb.mxu0 %v1297_v40  ;;  %v1281_v36 = vld [vmem:[#allocation14 + $0x330] sm:$0xff] }
 0x26c   : > { %1358 = vmatpush.msrb.mxu1 %v1278_v35  ;;  %1224 = vmatpush.msra.mxu2 %v1128_v37  ;;  %v1283_v35 = vld [vmem:[#allocation14 + $0x340] sm:$0xff]  ;;  %v1273_v40 = vld [vmem:[#allocation14 + $0x2f0] sm:$0xff] }
 0x26d   : > { %1345 = vmatpush.msrb.mxu0 %v1295_v44  ;;  %v1279_v37 = vld [vmem:[#allocation14 + $0x320] sm:$0xff]  ;;  %v1265_v44 = vld [vmem:[#allocation14 + $0x2b0] sm:$0xff] }
 0x26e   : > { %1359 = vmatpush.msrb.mxu1 %v1276_v38  ;;  %1225 = vmatpush.msra.mxu2 %v1126_v39  ;;  %v1277_v38 = vld [vmem:[#allocation14 + $0x310] sm:$0xff]  ;;  %v1275_v39 = vld [vmem:[#allocation14 + $0x300] sm:$0xff] }
 0x26f   : > { %1346 = vmatpush.msrb.mxu0 %v1293_v47  ;;  %v1259_v47 = vld [vmem:[#allocation14 + $0x280] sm:$0xff] }
 0x270   : > { %1360 = vmatpush.msrb.mxu1 %v1274_v41  ;;  %1226 = vmatpush.msra.mxu2 %v1124_v43  ;;  %v1271_v41 = vld [vmem:[#allocation14 + $0x2e0] sm:$0xff] }
 0x271   : > { %1347 = vmatpush.msrb.mxu0 %v1291_v50  ;;  %v1267_v43 = vld [vmem:[#allocation14 + $0x2c0] sm:$0xff] }
 0x272   : > { %1361 = vmatpush.msrb.mxu1 %v1272_v45  ;;  %1227 = vmatpush.msra.mxu2 %v1122_v46  ;;  %v1263_v45 = vld [vmem:[#allocation14 + $0x2a0] sm:$0xff]  ;;  %v1261_v46 = vld [vmem:[#allocation14 + $0x290] sm:$0xff] }
 0x274   : > { %1362 = vmatpush.msrb.mxu1 %v1270_v48  ;;  %1228 = vmatpush.msra.mxu2 %v1120_v49 }
 0x276   : > { %1363 = vmatpush.msrb.mxu1 %v1268_v51 }
 0x278   : > { %1364 = vmatpush.msrb.mxu1 %v1266_v52 }
 0x27a   : > { %1365 = vmatpush.msrb.mxu1 %v1264_v55  ;;  %v980_v55 = vld [vmem:[%s2788_s4] sm:$0x3] }
 0x27c   : > { %1366 = vmatpush.msrb.mxu1 %v1262_v56  ;;  %v983_v56 = vperm.slane %v980_v55, 1 }
 0x27e   : > { %1367 = vmatpush.msrb.mxu1 %v1260_v57 }
 0x2b3   : > { %v911_v14 = vpop.permute.xlu2 %910 }
 0x2b4   : > { %914 = vst.msk [vmem:[#allocation5 + $0x1] sm:$0x1] %vm913_vm15, %v911_v14 }
 0x2b5   : > { %916 = vst.msk [vmem:[#allocation5 + $0x9] sm:$0x1] %vm915_vm0, %v911_v14 }
 0x2bb   : > { %v940_v30 = vpop.permute.xlu2 %939 }
 0x2bc   : > { %942 = vst.msk [vmem:[#allocation5 + $0x4] sm:$0x1] %vm913_vm15, %v940_v30 }
 0x2bd   : > { %943 = vst.msk [vmem:[#allocation5 + $0xc] sm:$0x1] %vm915_vm0, %v940_v30 }
 0x2c3   : > { %v967_v42 = vpop.permute.xlu2 %966 }
 0x2c4   : > { %969 = vst.msk [vmem:[#allocation5 + $0x7] sm:$0x1] %vm913_vm15, %v967_v42 }
 0x2c5   : > { %970 = vst.msk [vmem:[#allocation5 + $0xf] sm:$0x1] %vm915_vm0, %v967_v42  ;;  %v1269_v42 = vld [vmem:[#allocation14 + $0x2d0] sm:$0xff] }
 0x2ca   : > { %v931_v53 = vpop.permute.xlu1 %930 }
 0x2cb   : > { %v922_v54 = vpop.permute.xlu0 %921  ;;  %933 = vst.msk [vmem:[#allocation5 + $0x3] sm:$0x1] %vm913_vm15, %v931_v53 }
 0x2cc   : > { %924 = vst.msk [vmem:[#allocation5 + $0x2] sm:$0x1] %vm913_vm15, %v922_v54 }
 0x2cd   : > { %925 = vst.msk [vmem:[#allocation5 + $0xa] sm:$0x1] %vm915_vm0, %v922_v54 }
 0x2ce   : > { %934 = vst.msk [vmem:[#allocation5 + $0xb] sm:$0x1] %vm915_vm0, %v931_v53 }
 0x2d2   : > { %v958_v58 = vpop.permute.xlu1 %957 }
 0x2d3   : > { %v949_v59 = vpop.permute.xlu0 %948  ;;  %960 = vst.msk [vmem:[#allocation5 + $0x6] sm:$0x1] %vm913_vm15, %v958_v58 }
 0x2d4   : > { %951 = vst.msk [vmem:[#allocation5 + $0x5] sm:$0x1] %vm913_vm15, %v949_v59 }
 0x2d5   : > { %952 = vst.msk [vmem:[#allocation5 + $0xd] sm:$0x1] %vm915_vm0, %v949_v59 }
 0x2d6   : > { %961 = vst.msk [vmem:[#allocation5 + $0xe] sm:$0x1] %vm915_vm0, %v958_v58 }
 0x2db   : > { %v976_v61 = vpop.permute.xlu0 %975  ;;  %v988_v62 = vld [vmem:[#allocation5] sm:$0xff] }
 0x2dc   : > { %978 = vst.msk [vmem:[#allocation5 + $0x10] sm:$0x1] %vm913_vm15, %v976_v61  ;;  %1049 = vmatmul.f32.vlgmr.msrb.gmra.mxu2 %v988_v62  ;;  %1089 = vmatmul.f32.vlgmr.msra.gmra.mxu0 %v988_v62  ;;  %v1115_v7 = vld [vmem:[#allocation5] sm:$0xfe] }
 0x2dd   : > { %979 = vst.msk [vmem:[#allocation5 + $0x18] sm:$0x1] %vm915_vm0, %v976_v61  ;;  %v989_v2 = vld [vmem:[#allocation5 + $0x8] sm:$0xff]  ;;  %1384 = vmatpush.msra.mxu0 %v1298_v60  ;;  %v1164_v12 = vrot.slane %v1115_v7, 1  ;;  %v1255_v25 = vld [vmem:[#allocation5] sm:$0xfc] }
 0x2de   : > { %1915 = vmatmul.msk.f32.vlgmr.msrb.gmra.mxu3 %vm901_vm13, %v989_v2  ;;  %v1256_v9 = vld [vmem:[#allocation5 + $0x8] sm:$0xfc]  ;;  %v1303_v30 = vrot.slane %v1255_v25, 2 }
 0x2df   : > { %1205 = vmatpush.msrb.mxu3 %v1157_v63  ;;  %1385 = vmatpush.msra.mxu0 %v1296_v1  ;;  %v1306_v15 = vrot.slane %v1256_v9, 2  ;;  %v1116_v23 = vld [vmem:[#allocation5 + $0x8] sm:$0xfe] }
 0x2e0   : > { %v1167_v28 = vrot.slane %v1116_v23, 1  ;;  %v1513_v23 = vld [vmem:[%s2790_s6 + $0x78] sm:$0xff]  ;;  %v1512_v25 = vld [vmem:[%s2790_s6 + $0x70] sm:$0xff] }
 0x2e1   : > { %1206 = vmatpush.msrb.mxu3 %v1155_v3  ;;  %1386 = vmatpush.msra.mxu0 %v1294_v4 }
 0x2e2   : > { %1514 = vmatpush.msrb.mxu2 %v1513_v23  ;;  %v1650_v23 = vld [vmem:[%s2793_s9 + $0x60] sm:$0xff] }
 0x2e3   : > { %1207 = vmatpush.msrb.mxu3 %v1153_v5  ;;  %v1117_v10 = vld [vmem:[#allocation5 + $0x10] sm:$0x1]  ;;  %1387 = vmatpush.msra.mxu0 %v1292_v6  ;;  %v982_v5 = vperm.slane %v980_v55, 0 }
 0x2e4   : > { %v1165_v13 = vrot.slane %v1117_v10, 1  ;;  %v1258_v14 = vld [vmem:[#allocation5 + $0x18] sm:$0x3]  ;;  %v1257_v21 = vld [vmem:[#allocation5 + $0x10] sm:$0x3]  ;;  %1515 = vmatpush.msrb.mxu2 %v1512_v25 }
 0x2e5   : > { %1208 = vmatpush.msrb.mxu3 %v1151_v8  ;;  %v1307_v16 = vrot.slane %v1258_v14, 2  ;;  %v1118_v19 = vld [vmem:[#allocation5 + $0x18] sm:$0x1]  ;;  %v1304_v27 = vrot.slane %v1257_v21, 2  ;;  %v1649_v25 = vld [vmem:[%s2793_s9 + $0x58] sm:$0xff] }
 0x2e6   : > { %1916 = vmatmul.msk.f32.vlgmr.msra.gmra.mxu3 %vm901_vm13, %v989_v2  ;;  %v1166_v17 = vsel %vm1163_vm3, %v1164_v12, %v1165_v13  ;;  %v1168_v24 = vrot.slane %v1118_v19, 1 }
 0x2e7   : > { %1245 = vmatpush.msra.mxu3 %v1158_v11  ;;  %1189 = vmatmul.f32.vlgmr.msra.gmra.mxu1 %v1166_v17  ;;  %v1308_v20 = vsel %vm552_vm2, %v1306_v15, %v1307_v16  ;;  %v1305_v33 = vsel %vm552_vm2, %v1303_v30, %v1304_v27  ;;  %v1511_v27 = vld [vmem:[%s2790_s6 + $0x68] sm:$0xff]  ;;  %v1469_v30 = vld [vmem:[%s2789_s5 + $0x58] sm:$0xff]  ;;  %vm1415_vm2 = vcmask 523520  }
 0x2e8   : > { %1229 = vmatmul.f32.vlgmr.msra.gmra.mxu2 %v1166_v17  ;;  %1919 = vmatmul.msk.f32.vlgmr.msrb.gmra.mxu0 %vm901_vm13, %v1308_v20  ;;  %v1169_v31 = vsel %vm1163_vm3, %v1167_v28, %v1168_v24  ;;  %v1472_v24 = vld [vmem:[%s2789_s5 + $0x70] sm:$0xff]  ;;  %v1470_v28 = vld [vmem:[%s2789_s5 + $0x60] sm:$0xff] }
 0x2e9   : > { %1246 = vmatpush.msra.mxu3 %v1156_v18  ;;  %1516 = vmatpush.msrb.mxu2 %v1511_v27  ;;  %v1648_v27 = vld [vmem:[%s2793_s9 + $0x50] sm:$0xff] }
 0x2eb   : > { %1247 = vmatpush.msra.mxu3 %v1154_v22  ;;  %v1473_v22 = vld [vmem:[%s2789_s5 + $0x78] sm:$0xff] }
 0x2ec   : > { %1478 = vmatpush.msrb.mxu0 %v1473_v22  ;;  %v1613_v22 = vld [vmem:[%s2792_s8 + $0x78] sm:$0xff] }
 0x2ed   : > { %1248 = vmatpush.msra.mxu3 %v1152_v26  ;;  %v1471_v26 = vld [vmem:[%s2789_s5 + $0x68] sm:$0xff] }
 0x2ee   : > { %1917 = vmatmul.msk.f32.vlgmr.msrb.gmra.mxu3 %vm901_vm13, %v1169_v31  ;;  %1479 = vmatpush.msrb.mxu0 %v1472_v24  ;;  %v1612_v24 = vld [vmem:[%s2792_s8 + $0x70] sm:$0xff] }
 0x2ef   : > { %1312 = vmatpush.msrb.mxu3 %v1289_v29  ;;  %1368 = vmatmul.f32.vlgmr.msrb.gmra.mxu1 %v1305_v33  ;;  %v1510_v29 = vld [vmem:[%s2790_s6 + $0x60] sm:$0xff] }
 0x2f0   : > { %1920 = vmatmul.msk.f32.vlgmr.msra.gmra.mxu0 %vm901_vm13, %v1308_v20  ;;  %1517 = vmatpush.msrb.mxu2 %v1510_v29  ;;  %v1647_v29 = vld [vmem:[%s2793_s9 + $0x48] sm:$0xff] }
 0x2f1   : > { %1313 = vmatpush.msrb.mxu3 %v1287_v32  ;;  %1480 = vmatpush.msrb.mxu0 %v1471_v26  ;;  %v1468_v32 = vld [vmem:[%s2789_s5 + $0x50] sm:$0xff]  ;;  %v1611_v26 = vld [vmem:[%s2792_s8 + $0x68] sm:$0xff] }
 0x2f3   : > { %1314 = vmatpush.msrb.mxu3 %v1285_v34  ;;  %1481 = vmatpush.msrb.mxu0 %v1470_v28  ;;  %v1467_v34 = vld [vmem:[%s2789_s5 + $0x48] sm:$0xff]  ;;  %v1610_v28 = vld [vmem:[%s2792_s8 + $0x60] sm:$0xff] }
 0x2f5   : > { %1315 = vmatpush.msrb.mxu3 %v1283_v35  ;;  %1482 = vmatpush.msrb.mxu0 %v1469_v30  ;;  %v1507_v35 = vld [vmem:[%s2790_s6 + $0x48] sm:$0xff]  ;;  %v1609_v30 = vld [vmem:[%s2792_s8 + $0x58] sm:$0xff] }
 0x2f6   : > { %1918 = vmatmul.msk.f32.vlgmr.msra.gmra.mxu3 %vm901_vm13, %v1169_v31  ;;  %v1509_v31 = vld [vmem:[%s2790_s6 + $0x58] sm:$0xff] }
 0x2f7   : > { %1316 = vmatpush.msrb.mxu3 %v1281_v36  ;;  %1518 = vmatpush.msrb.mxu2 %v1509_v31  ;;  %v1466_v36 = vld [vmem:[%s2789_s5 + $0x40] sm:$0xff] }
 0x2f8   : > { %1483 = vmatpush.msrb.mxu0 %v1468_v32  ;;  %v1646_v31 = vld [vmem:[%s2793_s9 + $0x40] sm:$0xff]  ;;  %v1608_v32 = vld [vmem:[%s2792_s8 + $0x50] sm:$0xff] }
 0x2f9   : > { %1317 = vmatpush.msrb.mxu3 %v1279_v37  ;;  %v1506_v37 = vld [vmem:[%s2790_s6 + $0x40] sm:$0xff] }
 0x2fa   : > { %1484 = vmatpush.msrb.mxu0 %v1467_v34  ;;  %v1607_v34 = vld [vmem:[%s2792_s8 + $0x48] sm:$0xff] }
 0x2fb   : > { %1318 = vmatpush.msrb.mxu3 %v1277_v38  ;;  %v1465_v38 = vld [vmem:[%s2789_s5 + $0x38] sm:$0xff] }
 0x2fc   : > { %1485 = vmatpush.msrb.mxu0 %v1466_v36  ;;  %v1606_v36 = vld [vmem:[%s2792_s8 + $0x40] sm:$0xff] }
 0x2fd   : > { %1319 = vmatpush.msrb.mxu3 %v1275_v39  ;;  %v1505_v39 = vld [vmem:[%s2790_s6 + $0x38] sm:$0xff] }
 0x2fe   : > { %1486 = vmatpush.msrb.mxu0 %v1465_v38  ;;  %v1605_v38 = vld [vmem:[%s2792_s8 + $0x38] sm:$0xff] }
 0x2ff   : > { %1320 = vmatpush.msrb.mxu3 %v1273_v40  ;;  %v1464_v40 = vld [vmem:[%s2789_s5 + $0x30] sm:$0xff] }
 0x300   : > { %1487 = vmatpush.msrb.mxu0 %v1464_v40  ;;  %v1604_v40 = vld [vmem:[%s2792_s8 + $0x30] sm:$0xff] }
 0x301   : > { %1321 = vmatpush.msrb.mxu3 %v1271_v41  ;;  %v1504_v41 = vld [vmem:[%s2790_s6 + $0x30] sm:$0xff] }
 0x303   : > { %1322 = vmatpush.msrb.mxu3 %v1269_v42  ;;  %v1463_v42 = vld [vmem:[%s2789_s5 + $0x28] sm:$0xff] }
 0x304   : > { %1488 = vmatpush.msrb.mxu0 %v1463_v42  ;;  %v1603_v42 = vld [vmem:[%s2792_s8 + $0x28] sm:$0xff] }
 0x305   : > { %1323 = vmatpush.msrb.mxu3 %v1267_v43  ;;  %v1503_v43 = vld [vmem:[%s2790_s6 + $0x28] sm:$0xff] }
 0x307   : > { %1324 = vmatpush.msrb.mxu3 %v1265_v44  ;;  %v1462_v44 = vld [vmem:[%s2789_s5 + $0x20] sm:$0xff] }
 0x308   : > { %1489 = vmatpush.msrb.mxu0 %v1462_v44  ;;  %v1601_v44 = vld [vmem:[%s2792_s8 + $0x18] sm:$0xff] }
 0x309   : > { %1325 = vmatpush.msrb.mxu3 %v1263_v45  ;;  %v1502_v45 = vld [vmem:[%s2790_s6 + $0x20] sm:$0xff] }
 0x30b   : > { %1326 = vmatpush.msrb.mxu3 %v1261_v46  ;;  %v1461_v46 = vld [vmem:[%s2789_s5 + $0x18] sm:$0xff] }
 0x30c   : > { %1490 = vmatpush.msrb.mxu0 %v1461_v46  ;;  %v1640_v46 = vld [vmem:[%s2793_s9 + $0x10] sm:$0xff] }
 0x30d   : > { %1327 = vmatpush.msrb.mxu3 %v1259_v47  ;;  %v1501_v47 = vld [vmem:[%s2790_s6 + $0x18] sm:$0xff] }
 0x30e   : > { %1328 = vmatmul.f32.vlgmr.msrb.gmra.mxu3 %v1305_v33  ;;  %v1508_v33 = vld [vmem:[%s2790_s6 + $0x50] sm:$0xff] }
 0x30f   : > { %1519 = vmatpush.msrb.mxu2 %v1508_v33  ;;  %v1645_v33 = vld [vmem:[%s2793_s9 + $0x38] sm:$0xff] }
 0x311   : > { %1520 = vmatpush.msrb.mxu2 %v1507_v35  ;;  %v1644_v35 = vld [vmem:[%s2793_s9 + $0x30] sm:$0xff] }
 0x313   : > { %1521 = vmatpush.msrb.mxu2 %v1506_v37  ;;  %v1643_v37 = vld [vmem:[%s2793_s9 + $0x28] sm:$0xff] }
 0x315   : > { %1522 = vmatpush.msrb.mxu2 %v1505_v39  ;;  %v1642_v39 = vld [vmem:[%s2793_s9 + $0x20] sm:$0xff] }
 0x317   : > { %1523 = vmatpush.msrb.mxu2 %v1504_v41  ;;  %v1641_v41 = vld [vmem:[%s2793_s9 + $0x18] sm:$0xff] }
 0x319   : > { %1524 = vmatpush.msrb.mxu2 %v1503_v43  ;;  %v1602_v43 = vld [vmem:[%s2792_s8 + $0x20] sm:$0xff] }
 0x31b   : > { %1525 = vmatpush.msrb.mxu2 %v1502_v45  ;;  %v1600_v45 = vld [vmem:[%s2792_s8 + $0x10] sm:$0xff] }
 0x31d   : > { %1526 = vmatpush.msrb.mxu2 %v1501_v47  ;;  %v1599_v47 = vld [vmem:[%s2792_s8 + $0x8] sm:$0xff] }
 0x359   : > { %v1090_v49 = vpop.f32.mrf.mxu0 }
 0x35f   : > { %v1050_v53 = vpop.f32.mrf.mxu2 }
 0x361   : > { %v1070_v48 = vpop.f32.mrf.mxu3 }
 0x362   : > { %v1071_v6 = vadd.f32 %v1070_v48, %v1050_v53  ;;  %v1460_v48 = vld [vmem:[%s2789_s5 + $0x10] sm:$0xff]  ;;  %v1498_v53 = vld [vmem:[%s2790_s6] sm:$0xff] }
 0x363   : > { %1491 = vmatpush.msrb.mxu0 %v1460_v48  ;;  %v1639_v48 = vld [vmem:[%s2793_s9 + $0x8] sm:$0xff] }
 0x364   : > { %v1190_v51 = vpop.f32.mrf.mxu1  ;;  %v1113_v8 = vadd.f32 %v1071_v6, %v982_v5 }
 0x365   : > { %v1349_v52 = vpop.f32.mrf.mxu0 }
 0x369   : > { %v1110_v50 = vpop.f32.mrf.mxu3 }
 0x36a   : > { %v1111_v57 = vadd.f32 %v1110_v50, %v1090_v49  ;;  %v1500_v49 = vld [vmem:[%s2790_s6 + $0x10] sm:$0xff]  ;;  %v1459_v50 = vld [vmem:[%s2789_s5 + $0x8] sm:$0xff] }
 0x36b   : > { %v1230_v58 = vpop.f32.mrf.mxu2  ;;  %1527 = vmatpush.msrb.mxu2 %v1500_v49  ;;  %1492 = vmatpush.msrb.mxu0 %v1459_v50  ;;  %v1598_v49 = vld [vmem:[%s2792_s8] sm:$0xff] }
 0x36c   : > { %v1369_v59 = vpop.f32.mrf.mxu1  ;;  %v1114_v62 = vadd.f32 %v1111_v57, %v983_v56  ;;  %v1638_v50 = vld [vmem:[%s2793_s9] sm:$0xff] }
 0x36d   : > { %v1389_v60 = vpop.f32.mrf.mxu0 }
 0x36e   : > { %v1390_v1 = vadd.f32 %v1389_v60, %v1369_v59 }
 0x371   : > { %v1210_v54 = vpop.f32.mrf.mxu3 }
 0x372   : > { %v1211_v7 = vadd.f32 %v1210_v54, %v1190_v51  ;;  %v1499_v51 = vld [vmem:[%s2790_s6 + $0x8] sm:$0xff] }
 0x373   : > { %1528 = vmatpush.msrb.mxu2 %v1499_v51 }
 0x374   : > { %v1253_v10 = vadd.f32 %v1211_v7, %v1113_v8  ;;  %v1534_v7 = vlaneseq }
 0x375   : > { %1529 = vmatpush.msrb.mxu2 %v1498_v53 }
 0x376   : > { %v1537_v8 = vand.u32 127, %v1534_v7 }
 0x379   : > { %v1250_v61 = vpop.f32.mrf.mxu3 }
 0x37a   : > { %v1251_v63 = vadd.f32 %v1250_v61, %v1230_v58 }
 0x37c   : > { %v1254_v2 = vadd.f32 %v1251_v63, %v1114_v62 }
 0x37e   : > { %v1393_v3 = vadd.f32 %v1390_v1, %v1254_v2 }
 0x380   : > { %v1395_v4 = vmax.f32 %v1393_v3, 0.0 }
 0x382   : > { %1431 = vrot.lane.b32.xlu0 %v1395_v4, %s2199_s1  ;;  %1419 = vrot.lane.b32.xlu2 %v1395_v4, %s2199_s1 }
 0x391   : > { %v1329_v9 = vpop.f32.mrf.mxu3 }
 0x392   : > { %v1350_v11 = vadd.f32 %v1349_v52, %v1329_v9  ;;  %v1458_v52 = vld [vmem:[%s2789_s5] sm:$0xff]  ;;  %v2617_v9 = vshrl.u32 %v1534_v7, 7 }
 0x393   : > { %1493 = vmatpush.msrb.mxu0 %v1458_v52 }
 0x394   : > { %v1392_v12 = vadd.f32 %v1350_v11, %v1253_v10  ;;  %v2619_v10 = vmul.u32 2, %v1537_v8  ;;  %v2018_v11 = vld [vmem:[%s2791_s7] ss:$0 sm:$0xff] }
 0x396   : > { %v1394_v13 = vmax.f32 %v1392_v12, 0.0  ;;  %vm1539_vm8 = vcmp.eq.s32.totalorder %v2617_v9, %v2619_v10 }
 0x398   : > { %1407 = vrot.lane.b32.xlu1 %v1394_v13, %s2199_s1 }
 0x3a0   : > { %1400 = vrot.lane.b32.xlu1 %v1394_v13, %s2199_s1 }
 0x3dc   : > { %v1420_v14 = vpop.permute.xlu2 %1419 }
 0x3dd   : > { %v1422_v15 = vmax.f32 %v1395_v4, %v1420_v14 }
 0x3df   : > { %1424 = vrot.lane.b32.xlu0 %v1422_v15, %s2202_s16  ;;  %v2630_v15 = vsel %vm1539_vm8, 1.0, %v2196_v0 }
 0x3f4   : > { %v1432_v16 = vpop.permute.xlu0 %1431 }
 0x3f5   : > { %v1434_v17 = vmax.f32 %v1395_v4, %v1432_v16  ;;  %v1653_v16 = vld [vmem:[%s2793_s9 + $0x78] sm:$0xff] }
 0x3f7   : > { %1436 = vrot.lane.b32.xlu1 %v1434_v17, %s2201_s15  ;;  %v1652_v17 = vld [vmem:[%s2793_s9 + $0x70] sm:$0xff]  ;;  %s439_s15 = scalar_lea.vmem [#allocation15], %s1893_s27  ;;  %s1777_s27 = scalar_lea.sflag [#allocation11], %s2363_s14 }
 0x3f8   : > { %s1789_s21 = sshll.u32 %s439_s15, 4  ;;  %s1790_s21 = int_to_ptr.vmem [resolvable:$true] %s1789_s21 }
 0x40a   : > { %v1408_v18 = vpop.permute.xlu1 %1407 }
 0x40b   : > { %v1410_v19 = vmax.f32 %v1394_v13, %v1408_v18 }
 0x40d   : > { %1412 = vrot.lane.b32.xlu2 %v1410_v19, %s2199_s1  ;;  %v1651_v19 = vld [vmem:[%s2793_s9 + $0x68] sm:$0xff]  ;;  %s1791_s1 = sshll.u32 %s1788_s29, 4  ;;  %s1792_s1 = int_to_ptr.hbm [resolvable:$true] %s1791_s1 }
 0x40e   : > { %s2132_s16 = sshra.s32 %s1792_s1, 4  ;;  %s2133_s16 = int_to_ptr.hbm [resolvable:$true] %s2132_s16 }
 0x40f   : > { %s2134_s22 = scalar_lea.hbm %s2133_s16, 16  ;;  %p2139_p11 = scmp.lt.s32.totalorder %s2133_s16, %s2795_s11 }
 0x410   : > { %p2135_p1 = scmp.ne.s32.totalorder %s2133_s16, %s2134_s22  ;;  %p2140_p2 = scmp.lt.s32.totalorder %s2138_s19, %s2134_s22 }
 0x412   : > { %v1401_v20 = vpop.permute.xlu1 %1400  ;;  %p2136_p4 = pnand %p2135_p1, %p2333_p3  ;;  %p2141_p9 = por %p2140_p2, %p2139_p11 }
 0x413   : > { %v1403_v21 = vmax.f32 %v1394_v13, %v1401_v20  ;;  %v2627_v13 = vadd.s32 1, %v2619_v10 }
 0x414   : > { %p2137_p8 = pneg %p2136_p4 }
 0x415   : > { %1404 = vst.msk [vmem:[#allocation7] sm:$0xff] %vm901_vm13, %v1403_v21  ;;  %vm1542_vm10 = vcmp.eq.s32.totalorder %v2617_v9, %v2627_v13 }
 0x416   : > { %v2646_v21 = vsel %vm1542_vm10, 1.0, %v2196_v0  ;;  %p2142_p10 = pnand %p2141_p9, %p2137_p8 }
 0x451   : > { %v1425_v55 = vpop.permute.xlu0 %1424 }
 0x467   : > { %v1413_v54 = vpop.permute.xlu2 %1412 }
 0x468   : > { %1416 = vst.msk [vmem:[#allocation7] sm:$0xff] %vm1415_vm2, %v1413_v54 }
 0x469   : > { %1428 = vst.msk [vmem:[#allocation7] sm:$0xff] %vm1427_vm5, %v1425_v55  ;;  %v1437_v56 = vpop.permute.xlu1 %1436  ;;  %v2019_v55 = vld [vmem:[%s2794_s10] ss:$0 sm:$0xff] }
 0x46a   : > { %1440 = vst.msk [vmem:[#allocation7] sm:$0xff] %vm1439_vm7, %v1437_v56 }
 0x471   : > { %v1441_v57 = vld [vmem:[#allocation7] sm:$0x1]  ;;  %v1442_v58 = vld [vmem:[#allocation7 + $0x1] sm:$0x1]  ;;  %v1445_v59 = vld [vmem:[#allocation7 + $0x2] sm:$0x1] }
 0x472   : > { %v1443_v60 = vmax.f32 %v1441_v57, %v1442_v58  ;;  %v1446_v61 = vld [vmem:[#allocation7 + $0x3] sm:$0x1]  ;;  %v1449_v62 = vld [vmem:[#allocation7 + $0x4] sm:$0x1]  ;;  %v1450_v63 = vld [vmem:[#allocation7 + $0x5] sm:$0x1] }
 0x473   : > { %v1447_v1 = vmax.f32 %v1445_v59, %v1446_v61  ;;  %v1451_v2 = vmax.f32 %v1449_v62, %v1450_v63  ;;  %v1453_v3 = vld [vmem:[#allocation7 + $0x6] sm:$0x1]  ;;  %v1454_v4 = vld [vmem:[#allocation7 + $0x7] sm:$0x1]  ;;  %v1674_v58 = vadd.s32 8, %v2617_v9 }
 0x474   : > { %v1455_v5 = vmax.f32 %v1453_v3, %v1454_v4  ;;  %1444 = vst [vmem:[#allocation8] sm:$0x1] %v1443_v60 }
 0x475   : > { %1448 = vst [vmem:[#allocation8 + $0x1] sm:$0x1] %v1447_v1  ;;  %vm1677_vm11 = vcmp.eq.s32.totalorder %v1674_v58, %v2627_v13  ;;  %vm1675_vm12 = vcmp.eq.s32.totalorder %v1674_v58, %v2619_v10 }
 0x476   : > { %1452 = vst [vmem:[#allocation8 + $0x2] sm:$0x1] %v1451_v2  ;;  %v1678_v61 = vsel %vm1677_vm11, 1.0, %v2196_v0  ;;  %v1676_v62 = vsel %vm1675_vm12, 1.0, %v2196_v0 }
 0x477   : > { %1456 = vst [vmem:[#allocation8 + $0x3] sm:$0x1] %v1455_v5 }
 0x47e   : > { %v1457_v6 = vld [vmem:[#allocation8] sm:$0xf] }
 0x47f   : > { %1494 = vmatmul.f32.vlgmr.msrb.gmra.mxu0 %v1457_v6  ;;  %1530 = vmatmul.f32.vlgmr.msrb.gmra.mxu2 %v1457_v6 }
 0x4fc   : > { %v1495_v12 = vpop.f32.mrf.mxu0 }
 0x4fd   : > { %v1496_v14 = vadd.f32 %v2018_v11, %v1495_v12 }
 0x4ff   : > { %1923 = vmatpush.msk.msra.mxu1 %vm641_vm4, %v1496_v14 }
 0x500   : > { %1924 = vmatmul.msk.f32.vlgmr.msra.gmra.mxu1 %vm1544_vm9, %v2630_v15 }
 0x501   : > { %1654 = vmatpush.msrb.mxu1 %v1653_v16 }
 0x502   : > { %v1531_v18 = vpop.f32.mrf.mxu2 }
 0x503   : > { %v1532_v20 = vadd.f32 %v2018_v11, %v1531_v18  ;;  %1655 = vmatpush.msrb.mxu1 %v1652_v17 }
 0x505   : > { %1921 = vmatpush.msk.msra.mxu3 %vm641_vm4, %v1532_v20  ;;  %1656 = vmatpush.msrb.mxu1 %v1651_v19  ;;  %vm1679_vm4 = vcmask 64512  }
 0x506   : > { %1922 = vmatmul.msk.f32.vlgmr.msra.gmra.mxu3 %vm1544_vm9, %v2646_v21 }
 0x507   : > { %1618 = vmatpush.msrb.mxu3 %v1613_v22  ;;  %1657 = vmatpush.msrb.mxu1 %v1650_v23 }
 0x509   : > { %1619 = vmatpush.msrb.mxu3 %v1612_v24  ;;  %1658 = vmatpush.msrb.mxu1 %v1649_v25 }
 0x50b   : > { %1620 = vmatpush.msrb.mxu3 %v1611_v26  ;;  %1659 = vmatpush.msrb.mxu1 %v1648_v27 }
 0x50d   : > { %1621 = vmatpush.msrb.mxu3 %v1610_v28  ;;  %1660 = vmatpush.msrb.mxu1 %v1647_v29 }
 0x50f   : > { %1622 = vmatpush.msrb.mxu3 %v1609_v30  ;;  %1661 = vmatpush.msrb.mxu1 %v1646_v31 }
 0x511   : > { %1623 = vmatpush.msrb.mxu3 %v1608_v32  ;;  %1662 = vmatpush.msrb.mxu1 %v1645_v33 }
 0x513   : > { %1624 = vmatpush.msrb.mxu3 %v1607_v34  ;;  %1663 = vmatpush.msrb.mxu1 %v1644_v35 }
 0x515   : > { %1625 = vmatpush.msrb.mxu3 %v1606_v36  ;;  %1664 = vmatpush.msrb.mxu1 %v1643_v37 }
 0x517   : > { %1626 = vmatpush.msrb.mxu3 %v1605_v38  ;;  %1665 = vmatpush.msrb.mxu1 %v1642_v39 }
 0x519   : > { %1627 = vmatpush.msrb.mxu3 %v1604_v40  ;;  %1666 = vmatpush.msrb.mxu1 %v1641_v41 }
 0x51b   : > { %1628 = vmatpush.msrb.mxu3 %v1603_v42  ;;  %1667 = vmatpush.msrb.mxu1 %v1640_v46 }
 0x51d   : > { %1629 = vmatpush.msrb.mxu3 %v1602_v43  ;;  %1668 = vmatpush.msrb.mxu1 %v1639_v48 }
 0x51f   : > { %1630 = vmatpush.msrb.mxu3 %v1601_v44  ;;  %1669 = vmatpush.msrb.mxu1 %v1638_v50 }
 0x521   : > { %1631 = vmatpush.msrb.mxu3 %v1600_v45 }
 0x523   : > { %1632 = vmatpush.msrb.mxu3 %v1599_v47 }
 0x525   : > { %1633 = vmatpush.msrb.mxu3 %v1598_v49 }
 0x57d   : > { %v1594_v51 = vpop.f32.mrf.mxu1 }
 0x589   : > { %v1568_v52 = vpop.f32.mrf.mxu3 }
 0x58a   : > { %v1595_v53 = vadd.f32 %v1594_v51, %v1568_v52 }
 0x58c   : > { %v1597_v54 = vmax.f32 %v1595_v53, 0.0 }
 0x58e   : > { %1634 = vmatmul.f32.vlgmr.msrb.gmra.mxu3 %v1597_v54  ;;  %1670 = vmatmul.f32.vlgmr.msrb.gmra.mxu1 %v1597_v54 }
 0x60b   : > { %v1671_v56 = vpop.f32.mrf.mxu1 }
 0x60c   : > { %v1672_v57 = vadd.f32 %v2019_v55, %v1671_v56 }
 0x60e   : > { %1700 = vmatpush.msra.mxu0 %v1672_v57 }
 0x60f   : > { %1925 = vmatmul.msk.f32.vlgmr.msra.gmra.mxu0 %vm1679_vm4, %v2646_v21 }
 0x611   : > { %v1635_v59 = vpop.f32.mrf.mxu3 }
 0x612   : > { %v1636_v60 = vadd.f32 %v2019_v55, %v1635_v59 }
 0x614   : > { %1728 = vmatpush.msra.mxu2 %v1636_v60 }
 0x615   : > { %1927 = vmatmul.msk.f32.vlgmr.msra.gmra.mxu2 %vm1679_vm4, %v2630_v15 }
 0x617   : > { %1926 = vmatmul.msk.f32.gmra.mxu0 %vm1679_vm4, %v1678_v61 }
 0x61d   : > { %1928 = vmatmul.msk.f32.gmra.mxu2 %vm1679_vm4, %v1676_v62 }
 0x68c   : > { %v1702_v63 = vpop.f32.mrf.mxu0 }
 0x694   : > { %v1705_v5 = vpop.f32.mrf.mxu0 }
 0x698   : > { %v1730_v1 = vpop.f32.mrf.mxu2 }
 0x699   : > { %v1731_v2 = vadd.f32 %v1730_v1, %v1702_v63 }
 0x69b   : > { %v1736_v3 = vsub.f32 0.0, %v1731_v2 }
 0x69d   : > { %v1738_v4 = vmul.f32 1.442695, %v1736_v3 }
 0x69f   : > { %2020 = vpow2.f32 %v1738_v4 }
 0x6a0   : > { %v1733_v6 = vpop.f32.mrf.mxu2 }
 0x6a1   : > { %v1734_v7 = vadd.f32 %v1733_v6, %v1705_v5 }
 0x6a3   : > { %v1737_v8 = vsub.f32 0.0, %v1734_v7 }
 0x6a5   : > { %v2021_v9 = vpop.eup %2020  ;;  %v1740_v11 = vmul.f32 1.442695, %v1737_v8 }
 0x6a6   : > { %v1742_v12 = vadd.f32 1.0, %v2021_v9 }
 0x6a7   : > { %2022 = vpow2.f32 %v1740_v11 }
 0x6a8   : > { %2024 = vrcp.f32 %v1742_v12  ;;  %v1755_v16 = vand.u32 2147483648, %v1742_v12  ;;  %v1753_v18 = vand.u32 2147483647, %v1742_v12  ;;  %vm1749_vm14 = vweird.f32 %v1742_v12 }
 0x6aa   : > { %v1756_v21 = vor.u32 1.1754944e-38, %v1755_v16  ;;  %vm1754_vm0 = vcmp.eq.f32.partialorder %v1753_v18, 8.507059e+37 }
 0x6ad   : > { %v2023_v10 = vpop.eup %2022 }
 0x6ae   : > { %v2025_v13 = vpop.eup %2024  ;;  %v1743_v0 = vadd.f32 1.0, %v2023_v10 }
 0x6af   : > { %v1745_v14 = vmul.f32 %v2025_v13, %v1742_v12  ;;  %vm1750_vm13 = vweird.f32 %v2025_v13 }
 0x6b0   : > { %2026 = vrcp.f32 %v1743_v0  ;;  %vm1751_vm15 = vmor %vm1749_vm14, %vm1750_vm13  ;;  %v1770_v26 = vand.u32 2147483648, %v1743_v0  ;;  %v1768_v28 = vand.u32 2147483647, %v1743_v0  ;;  %vm1764_vm3 = vweird.f32 %v1743_v0 }
 0x6b1   : > { %v1746_v15 = vsub.f32 1.0, %v1745_v14 }
 0x6b2   : > { %v1771_v30 = vor.u32 1.1754944e-38, %v1770_v26  ;;  %vm1769_vm5 = vcmp.eq.f32.partialorder %v1768_v28, 8.507059e+37 }
 0x6b3   : > { %v1747_v17 = vmul.f32 %v2025_v13, %v1746_v15 }
 0x6b5   : > { %v1748_v19 = vadd.f32 %v2025_v13, %v1747_v17 }
 0x6b6   : > { %v2027_v20 = vpop.eup %2026 }
 0x6b7   : > { %v1752_v22 = vsel %vm1751_vm15, %v2025_v13, %v1748_v19  ;;  %v1760_v23 = vmul.f32 %v2027_v20, %v1743_v0  ;;  %vm1765_vm1 = vweird.f32 %v2027_v20 }
 0x6b8   : > { %v1757_v24 = vsel %vm1754_vm0, %v1756_v21, %v1752_v22  ;;  %vm1766_vm2 = vmor %vm1764_vm3, %vm1765_vm1 }
 0x6b9   : > { %v1761_v25 = vsub.f32 1.0, %v1760_v23  ;;  %1774 = vst.msk [vmem:[%s439_s15] sm:$0xff] %vm736_vm6, %v1757_v24 }
 0x6bb   : > { %v1762_v27 = vmul.f32 %v2027_v20, %v1761_v25 }
 0x6bd   : > { %v1763_v29 = vadd.f32 %v2027_v20, %v1762_v27 }
 0x6bf   : > { %v1767_v31 = vsel %vm1766_vm2, %v2027_v20, %v1763_v29 }
 0x6c0   : > { %v1772_v32 = vsel %vm1769_vm5, %v1771_v30, %v1767_v31 }
 0x6c1   : > { %1775 = vst.msk [vmem:[%s439_s15 + $0x8] sm:$0xff] %vm736_vm6, %v1772_v32 }
 0x6c2   : > { %2145 = shalt.err (!%p2142_p10)
}
 0x6c3   : > { %s2205_s14 = smov 128   ;;  %s2206_s23 = smov 8  }
 0x6c4   : > { %1946 = dma.vmem_to_hbm [thread:$0]  (%p2333_p3), %s1790_s21, 256, %s1792_s1, %s1777_s27, %s2205_s14, %s2205_s14, %s2206_s23  }
 0x6c5 PF: > { %s1806_s28 = sand.u32 1, %s2176_s17   ;;  %p2811_p12 = scmp.ge.s32.totalorder %s2188_s20, 2 }
 0x6c6   : > { %s1807_s26 = scalar_lea.sflag [#allocation11], %s1806_s28 }
 0x6c7   : > { %p1960_p13 = pnand %p2811_p12, %p2302_p6 }
 0x6c9   : > { %p1961_p0 = pneg %p1960_p13 }
 0x6cb   : > { %2171 = dma.done.wait (%p1961_p0), %s1807_s26, 256  }
 0x6cc   : > { %2173 = vsyncadd (%p1961_p0), %s1807_s26, 4294967040  ;;  %s2812_s20 = sld [smem:[#allocation20_spill]]  ;;  %s2815_s17 = smov %s2180_s18 }
 0x6cd   : > { %s2813_s29 = sld [smem:[#allocation19_spill]] }
 0x6ce   : > { %s2814_s19 = sld [smem:[#allocation21_spill]] }
 0x6d2   : > { %p25_p5 = scmp.ge.s32.totalorder %s2812_s20, 4  }
 0x6d3   : > { %s2816_s18 = smov %s2813_s29 }
 0x6d4   :  { %27 = sbr.rel (!%p25_p5) target bundleno = 9 (0x9), region = 117 }
 0x6d9   :  { %1813 = vsyncpa [#allocation10], 1 }
 0x6da   :  { %1815 = vsyncpa [#allocation10 + $0x1], 1 }
 0x6db   :  { %1816 = vsyncpa [#allocation13], 1 }
 0x6dc   :  { %1817 = vsyncpa [#allocation11], 1 }
 0x6dd   :  { %1819 = vsyncpa [#allocation11 + $0x1], 1 }

</bundles_post_ra>
